<compile_context>
chip_gen: v7x
topology: tpu7x:2x2x1
jax: 0.10.0
libtpu: 0.0.40
codegen_flags: <defaults>
</compile_context>

<pallas_src>
import functools

import numpy as np
import jax
import jax.numpy as jnp
from jax.experimental import pallas as pl
from jax.experimental.pallas import tpu as pltpu

_EPS = 1e-5
_LANE = 128


# ---------------------------------------------------------------------------
# small helpers: lane tiling / padding / VMEM budgeting
# ---------------------------------------------------------------------------
def _round_up(x, m):
    return ((x + m - 1) // m) * m


def _default_lane_tile():
    """Per-generation default lane-tile width for the full-resolution kernels."""
    try:
        kind = jax.devices()[0].device_kind.lower()
    except Exception:
        return 1024
    if "v5 lite" in kind or "v5e" in kind or "v5litepod" in kind:
        return 512          # smallest scoped-VMEM default / lowest HBM BW
    if "v6" in kind:
        return 2048          # 128 MiB VMEM: keep big roofline-friendly tiles
    return 1024              # v7x (64 MiB VMEM) / unknown


def _choose_lane_tiling(L, max_tile, min_tiles=1):
    """Lane tile (multiple of 128) + padded length (multiple of the tile).

    Pads L up to a multiple of the tile instead of silently falling back to
    128-lane tiles when L has awkward factors.
    """
    base = max(_LANE, _round_up(L, _LANE))
    tile = min(max(_LANE, (max_tile // _LANE) * _LANE), base)
    while min_tiles > 1 and tile > _LANE and -(-base // tile) < min_tiles:
        tile -= _LANE
    return tile, _round_up(base, tile)


def _pad_lanes_to(x, Lp):
    L = x.shape[-1]
    if L == Lp:
        return x
    pad = [(0, 0)] * (x.ndim - 1) + [(0, Lp - L)]
    return jnp.pad(x, pad)


def _vmem_limit(block_bytes):
    """Explicit scoped-VMEM limit: double-buffered block set + headroom."""
    return int(min(64 * 2 ** 20, max(32 * 2 ** 20, 3 * block_bytes)))


# ---------------------------------------------------------------------------
# pltpu.roll direction probe (defensive): the 3x3 tap shifts depend on the
# rotation direction, so pin it against jnp.roll once, eagerly, at runtime.
# ---------------------------------------------------------------------------
_ROLL_TO_NUMPY_SIGN = None


def _roll_sign():
    """-1 if pltpu.roll matches jnp.roll (expected), +1 for the opposite sign."""
    global _ROLL_TO_NUMPY_SIGN
    if _ROLL_TO_NUMPY_SIGN is None:
        try:
            x = jnp.tile(jnp.arange(256, dtype=jnp.float32), (8, 1))

            def k(x_ref, o_ref):
                o_ref[...] = pltpu.roll(x_ref[...], 3, 1)

            y = pl.pallas_call(
                k, out_shape=jax.ShapeDtypeStruct((8, 256), jnp.float32))(x)
            _ROLL_TO_NUMPY_SIGN = (
                -1 if bool(jnp.array_equal(y, jnp.roll(x, 3, axis=1))) else 1)
        except Exception:
            _ROLL_TO_NUMPY_SIGN = -1   # assume jnp.roll semantics
    return _ROLL_TO_NUMPY_SIGN


# ---------------------------------------------------------------------------
# Kernel A: one read of x -> BN/ReLU -> two 1x1 convs (branch0 + shortcut)
# ---------------------------------------------------------------------------
def _branch0_shortcut_kernel(x_ref, s0_ref, b0_ref, ss_ref, bs_ref,
                             w0_ref, ws_ref, br_ref, sh_ref):
    x = x_ref[0]
    a0 = jnp.maximum(x * s0_ref[...] + b0_ref[...], 0.0).astype(w0_ref.dtype)
    a1 = jnp.maximum(x * ss_ref[...] + bs_ref[...], 0.0).astype(ws_ref.dtype)
    br_ref[0] = jnp.dot(w0_ref[...], a0,
                        preferred_element_type=jnp.float32).astype(br_ref.dtype)
    sh_ref[0] = jnp.dot(ws_ref[...], a1,
                        preferred_element_type=jnp.float32).astype(sh_ref.dtype)


def branch0_and_shortcut(x3, s0, b0, ss, bs, w0, ws, tile):
    """x3: (N, Cin, Lp) f32 -> (branch0 (N, mid, Lp) f32, shortcut (N, Cout, Lp) f32)."""
    N, Cin, Lp = x3.shape
    mid, Cout = w0.shape[0], ws.shape[0]
    grid = (N, Lp // tile)
    wbytes = (mid + Cout) * Cin * w0.dtype.itemsize
    blk = 4 * tile * (Cin + mid + Cout) + wbytes + 16 * Cin
    cost = pl.CostEstimate(
        flops=2 * N * Lp * Cin * (mid + Cout) + 4 * N * Cin * Lp,
        transcendentals=0,
        bytes_accessed=4 * N * Lp * (Cin + mid + Cout) + wbytes)
    return pl.pallas_call(
        _branch0_shortcut_kernel,
        out_shape=(jax.ShapeDtypeStruct((N, mid, Lp), jnp.float32),
                   jax.ShapeDtypeStruct((N, Cout, Lp), jnp.float32)),
        grid_spec=pltpu.PrefetchScalarGridSpec(
            num_scalar_prefetch=0,
            grid=grid,
            in_specs=[
                pl.BlockSpec((1, Cin, tile), lambda n, l: (n, 0, l)),
                pl.BlockSpec((Cin, 1), lambda n, l: (0, 0)),
                pl.BlockSpec((Cin, 1), lambda n, l: (0, 0)),
                pl.BlockSpec((Cin, 1), lambda n, l: (0, 0)),
                pl.BlockSpec((Cin, 1), lambda n, l: (0, 0)),
                pl.BlockSpec((mid, Cin), lambda n, l: (0, 0)),
                pl.BlockSpec((Cout, Cin), lambda n, l: (0, 0)),
            ],
            out_specs=(
                pl.BlockSpec((1, mid, tile), lambda n, l: (n, 0, l)),
                pl.BlockSpec((1, Cout, tile), lambda n, l: (n, 0, l)),
            ),
        ),
        compiler_params=pltpu.CompilerParams(
            dimension_semantics=("parallel", "parallel"),
            vmem_limit_bytes=_vmem_limit(blk)),
        cost_estimate=cost,
    )(x3, s0, b0, ss, bs, w0, ws)


# ---------------------------------------------------------------------------
# Kernel B (fused tail): per image, iterate the 5 compression groups on an
# 'arbitrary' grid axis.  Group 0 initializes the accumulator with
# shortcut + Wc0 @ relu(BN(branch0)); groups 1..4 compute
# act = relu(BN(up_k + branch0)), the 3x3 proc conv as 9 shifted (mid x mid)
# matmuls (pltpu.roll + boundary masks), then relu(BN(.)) and the group's 1x1
# compression matmul, accumulating into a f32 VMEM scratch.
# ---------------------------------------------------------------------------
def _make_tail_kernel(img_w, Lp):
    sgn = _roll_sign()
    # tap t = (dy+1)*3 + (dx+1); flattened-index shift s_t = dy*W + dx.
    shifts = tuple((sgn * (dy * img_w + dx)) % Lp
                   for dy in (-1, 0, 1) for dx in (-1, 0, 1))

    def kernel(up_ref, b0_ref, sh_ref, m_ref, sp_ref, bp_ref, wp_ref,
               sc_ref, bc_ref, wc_ref, o_ref, acc_ref):
        g = pl.program_id(1)
        cdt = wc_ref.dtype

        @pl.when(g == 0)
        def _init():
            z0 = jnp.maximum(b0_ref[0] * sc_ref[0] + bc_ref[0], 0.0).astype(cdt)
            acc_ref[...] = sh_ref[0] + jnp.dot(
                wc_ref[0], z0, preferred_element_type=jnp.float32)

        @pl.when(g > 0)
        def _proc_group():
            act = jnp.maximum(
                (up_ref[0, 0] + b0_ref[0]) * sp_ref[0] + bp_ref[0], 0.0)
            masks = m_ref[...]
            wp = wp_ref[0]
            proc = jnp.zeros(act.shape, jnp.float32)
            for t, r in enumerate(shifts):
                rolled = act if r == 0 else pltpu.roll(act, r, 1)
                a_t = (rolled * masks[t:t + 1, :]).astype(cdt)
                proc = proc + jnp.dot(wp[t], a_t,
                                      preferred_element_type=jnp.float32)
            z = jnp.maximum(proc * sc_ref[0] + bc_ref[0], 0.0).astype(cdt)
            acc_ref[...] += jnp.dot(wc_ref[0], z,
                                    preferred_element_type=jnp.float32)

        @pl.when(g == pl.num_programs(1) - 1)
        def _write():
            o_ref[0] = acc_ref[...].astype(o_ref.dtype)

    return kernel


def dappm_tail(up_all, branch0, shortcut, masks, sp, bp, wp, sc, bc, wc, img_w):
    """up_all (N,4,mid,Lp), branch0 (N,mid,Lp), shortcut (N,Cout,Lp) -> (N,Cout,Lp)."""
    N, _, mid, Lp = up_all.shape
    Cout = wc.shape[1]
    prev = lambda g: jnp.maximum(g - 1, 0)      # groups 1..4 -> stacked index 0..3
    wbytes = 9 * mid * mid * wp.dtype.itemsize + Cout * mid * wc.dtype.itemsize
    blk = 4 * Lp * (2 * mid + 3 * Cout) + 4 * 9 * Lp + wbytes
    cost = pl.CostEstimate(
        flops=2 * N * Lp * (5 * Cout * mid + 36 * mid * mid) + 30 * N * mid * Lp,
        transcendentals=0,
        bytes_accessed=4 * N * Lp * (5 * mid + 2 * Cout) + 4 * wbytes + 36 * Lp)
    return pl.pallas_call(
        _make_tail_kernel(img_w, Lp),
        out_shape=jax.ShapeDtypeStruct((N, Cout, Lp), jnp.float32),
        grid_spec=pltpu.PrefetchScalarGridSpec(
            num_scalar_prefetch=0,
            grid=(N, 5),
            in_specs=[
                pl.BlockSpec((1, 1, mid, Lp), lambda n, g: (n, prev(g), 0, 0)),
                pl.BlockSpec((1, mid, Lp), lambda n, g: (n, 0, 0)),
                pl.BlockSpec((1, Cout, Lp), lambda n, g: (n, 0, 0)),
                pl.BlockSpec((9, Lp), lambda n, g: (0, 0)),
                pl.BlockSpec((1, mid, 1), lambda n, g: (prev(g), 0, 0)),
                pl.BlockSpec((1, mid, 1), lambda n, g: (prev(g), 0, 0)),
                pl.BlockSpec((1, 9, mid, mid), lambda n, g: (prev(g), 0, 0, 0)),
                pl.BlockSpec((1, mid, 1), lambda n, g: (g, 0, 0)),
                pl.BlockSpec((1, mid, 1), lambda n, g: (g, 0, 0)),
                pl.BlockSpec((1, Cout, mid), lambda n, g: (g, 0, 0)),
            ],
            out_specs=pl.BlockSpec((1, Cout, Lp), lambda n, g: (n, 0, 0)),
            scratch_shapes=[pltpu.VMEM((Cout, Lp), jnp.float32)],
        ),
        compiler_params=pltpu.CompilerParams(
            dimension_semantics=("parallel", "arbitrary"),
            vmem_limit_bytes=_vmem_limit(blk)),
        cost_estimate=cost,
    )(up_all, branch0, shortcut, masks, sp, bp, wp, sc, bc, wc)


# ---------------------------------------------------------------------------
# XLA glue: pooling windows, tiny bilinear resizes, folded BN helpers
# ---------------------------------------------------------------------------
def avg_pool_nchw(x, k, s, p):
    """PyTorch AvgPool2d(kernel=k, stride=s, padding=p, count_include_pad=True)."""
    xp = jnp.pad(x, ((0, 0), (0, 0), (p, p), (p, p)))
    summed = jax.lax.reduce_window(xp, 0.0, jax.lax.add,
                                   window_dimensions=(1, 1, k, k),
                                   window_strides=(1, 1, s, s),
                                   padding='VALID')
    return summed / float(k * k)


@functools.lru_cache(maxsize=None)
def _bilinear_matrix_np(out_size, in_size):
    """Row-interp matrix matching F.interpolate(mode='bilinear', align_corners=False)."""
    m = np.zeros((out_size, in_size), np.float32)
    if in_size == 1:
        m[:, 0] = 1.0
        return m
    scale = in_size / out_size
    for o in range(out_size):
        src = max((o + 0.5) * scale - 0.5, 0.0)
        i0 = min(int(np.floor(src)), in_size - 1)
        i1 = min(i0 + 1, in_size - 1)
        f = src - i0
        m[o, i0] += 1.0 - f
        m[o, i1] += f
    return m


def bilinear_upsample(y, H, W):
    """Bilinear-resize NCHW `y` to (H, W); PyTorch align_corners=False semantics."""
    Uh = jnp.asarray(_bilinear_matrix_np(H, y.shape[2]))
    Uw = jnp.asarray(_bilinear_matrix_np(W, y.shape[3]))
    return jnp.einsum('ab,cd,nkbd->nkac', Uh, Uw, y,
                      precision=jax.lax.Precision.HIGHEST)


def _fold_bn(bn):
    """Eval-mode BN -> (scale, bias) of shape (C, 1)."""
    s = bn['gamma'] / jnp.sqrt(bn['var'] + _EPS)
    b = bn['beta'] - bn['mean'] * s
    return s[:, None], b[:, None]


def _bn_relu_nchw(t, bn):
    s = bn['gamma'] / jnp.sqrt(bn['var'] + _EPS)
    b = bn['beta'] - bn['mean'] * s
    return jnp.maximum(t * s[None, :, None, None] + b[None, :, None, None], 0.0)


def _conv1x1_nchw(t, w):
    return jnp.einsum('oc,nchw->nohw', w, t, precision=jax.lax.Precision.HIGHEST)


def _tap_masks(H, W, Lp):
    """(9, Lp) validity masks for the 3x3 taps on the flattened (zero-padded) plane."""
    m = np.zeros((9, Lp), np.float32)
    q = np.arange(H * W)
    h, w = q // W, q % W
    t = 0
    for dy in (-1, 0, 1):
        for dx in (-1, 0, 1):
            ok = (h + dy >= 0) & (h + dy < H) & (w + dx >= 0) & (w + dx < W)
            m[t, :H * W] = ok.astype(np.float32)
            t += 1
    return jnp.asarray(m)


# ---------------------------------------------------------------------------
# Full DaPPM forward (Pallas kernels + XLA glue)
# ---------------------------------------------------------------------------
def dappm_forward(x, params, *, compute_dtype=jnp.bfloat16, max_lane_tile=None):
    """x: (N, Cin, H, W) -> (N, Cout, H, W). Eval-mode BN folded to scale/bias."""
    # TODO(synk): training-mode BatchNorm (batch statistics) is not reproduced;
    # eval-mode running-stat affine fold is used (module.eval() semantics).
    N, Cin, H, W = x.shape
    HW = H * W
    mid = params['w_b0'].shape[0]
    Cout = params['w_short'].shape[0]
    if max_lane_tile is None:
        max_lane_tile = _default_lane_tile()
    tile, Lp = _choose_lane_tiling(HW, max_lane_tile,
                                   min_tiles=2 if N == 1 else 1)
    cdt = jnp.dtype(compute_dtype)

    x3 = _pad_lanes_to(x.reshape(N, Cin, HW), Lp)   # channels on sublanes

    # Full-resolution BN/ReLU + the two 1x1 convs that read x (branch0 and the
    # shortcut) fused into one Pallas pass: x is streamed from HBM exactly once.
    s0, b0 = _fold_bn(params['bn_b0'])
    sS, bS = _fold_bn(params['bn_short'])
    branch0, shortcut = branch0_and_shortcut(
        x3, s0, b0, sS, bS,
        params['w_b0'].astype(cdt), params['w_short'].astype(cdt), tile)

    # Pooled branches 1..4: pooling, BN/ReLU, tiny 1x1 convs and bilinear
    # upsampling stay in XLA (<=1/4-resolution maps, negligible FLOPs, poor
    # lane occupancy in a dedicated Pallas launch).
    # TODO(synk): strided avg-pool windows / bilinear resizes are left to XLA.
    pooled = [avg_pool_nchw(x, 5, 2, 2),
              avg_pool_nchw(x, 9, 4, 4),
              avg_pool_nchw(x, 17, 8, 8),
              jnp.mean(x, axis=(2, 3), keepdims=True)]
    ups = []
    for k, pk in enumerate(pooled, start=1):
        yk = _conv1x1_nchw(_bn_relu_nchw(pk, params[f'bn_b{k}']),
                           params[f'w_b{k}'])
        ups.append(bilinear_upsample(yk, H, W).reshape(N, mid, HW))
    up_all = _pad_lanes_to(jnp.stack(ups, axis=1), Lp)      # (N, 4, mid, Lp)

    # Per-group parameters for the fused tail kernel.
    sp = jnp.stack([_fold_bn(params[f'bn_p{k}'])[0] for k in range(1, 5)])
    bp = jnp.stack([_fold_bn(params[f'bn_p{k}'])[1] for k in range(1, 5)])
    wp = jnp.stack([params[f'w_p{k}'].transpose(2, 3, 0, 1).reshape(9, mid, mid)
                    for k in range(1, 5)]).astype(cdt)       # (4, 9, mid, mid)
    scg, bcg = _fold_bn(params['bn_comp'])                   # (5*mid, 1)
    sc = scg.reshape(5, mid, 1)
    bc = bcg.reshape(5, mid, 1)
    wc = params['w_comp'].reshape(Cout, 5, mid).transpose(1, 0, 2).astype(cdt)
    masks = _tap_masks(H, W, Lp)                             # (9, Lp) f32

    # TODO(synk): for batch-1 inference the tail grid is (1, 5) with the group
    # axis 'arbitrary', so only one v7x TensorCore is used for the tail.
    out3 = dappm_tail(up_all, branch0, shortcut, masks,
                      sp, bp, wp, sc, bc, wc, W)             # (N, Cout, Lp)
    return out3[:, :, :HW].reshape(N, Cout, H, W)


# ---------------------------------------------------------------------------
# Parameters + pure-JAX reference
# ---------------------------------------------------------------------------
def _make_bn(key, c):
    k1, k2, k3, k4 = jax.random.split(key, 4)
    return dict(
        gamma=1.0 + 0.1 * jax.random.normal(k1, (c,), jnp.float32),
        beta=0.1 * jax.random.normal(k2, (c,), jnp.float32),
        mean=0.1 * jax.random.normal(k3, (c,), jnp.float32),
        var=0.5 + jax.random.uniform(k4, (c,), jnp.float32),
    )


def make_params(key, in_ch, mid_ch, out_ch):
    keys = iter(jax.random.split(key, 22))
    p = {}
    for k in range(5):
        p[f'bn_b{k}'] = _make_bn(next(keys), in_ch)
        p[f'w_b{k}'] = 0.1 * jax.random.normal(next(keys), (mid_ch, in_ch), jnp.float32)
    for k in range(1, 5):
        p[f'bn_p{k}'] = _make_bn(next(keys), mid_ch)
        p[f'w_p{k}'] = 0.1 * jax.random.normal(next(keys), (mid_ch, mid_ch, 3, 3),
                                               jnp.float32)
    p['bn_short'] = _make_bn(next(keys), in_ch)
    p['w_short'] = 0.1 * jax.random.normal(next(keys), (out_ch, in_ch), jnp.float32)
    p['bn_comp'] = _make_bn(next(keys), 5 * mid_ch)
    p['w_comp'] = 0.1 * jax.random.normal(next(keys), (out_ch, 5 * mid_ch), jnp.float32)
    return p


def dappm_reference(x, params):
    """Pure-JAX reference mirroring the PyTorch forward (eval-mode BN)."""
    hp = jax.lax.Precision.HIGHEST

    def conv3x3(t, w):
        return jax.lax.conv_general_dilated(
            t, w, window_strides=(1, 1), padding=((1, 1), (1, 1)),
            dimension_numbers=('NCHW', 'OIHW', 'NCHW'), precision=hp)

    N, _, H, W = x.shape
    b0 = _conv1x1_nchw(_bn_relu_nchw(x, params['bn_b0']), params['w_b0'])
    pooled = [avg_pool_nchw(x, 5, 2, 2),
              avg_pool_nchw(x, 9, 4, 4),
              avg_pool_nchw(x, 17, 8, 8),
              jnp.mean(x, axis=(2, 3), keepdims=True)]
    branches = []
    for k, pk in enumerate(pooled, start=1):
        y = _conv1x1_nchw(_bn_relu_nchw(pk, params[f'bn_b{k}']), params[f'w_b{k}'])
        branches.append(bilinear_upsample(y, H, W) + b0)
    procs = [conv3x3(_bn_relu_nchw(branches[k - 1], params[f'bn_p{k}']),
                     params[f'w_p{k}'])
             for k in range(1, 5)]
    cat = jnp.concatenate([b0] + procs, axis=1)
    out = _conv1x1_nchw(_bn_relu_nchw(cat, params['bn_comp']), params['w_comp'])
    return out + _conv1x1_nchw(_bn_relu_nchw(x, params['bn_short']), params['w_short'])


if __name__ == "__main__":
    key = jax.random.PRNGKey(0)
    k_x, k_params = jax.random.split(key)

    N, Cin, MID, Cout, H, W = 2, 4, 8, 16, 16, 16
    x = jax.random.normal(k_x, (N, Cin, H, W), jnp.float32)
    params = make_params(k_params, Cin, MID, Cout)

    _roll_sign()   # pin pltpu.roll direction eagerly (outside any jit trace)

    fwd_bf16 = jax.jit(functools.partial(dappm_forward, compute_dtype=jnp.bfloat16))
    fwd_f32 = jax.jit(functools.partial(dappm_forward, compute_dtype=jnp.float32))

    out = jax.block_until_ready(fwd_bf16(x, params))
    out_f32 = jax.block_until_ready(fwd_f32(x, params))
    ref = dappm_reference(x, params)

    assert out.shape == (N, Cout, H, W)
    err32 = float(jnp.max(jnp.abs(out_f32 - ref)))
    errbf = float(jnp.max(jnp.abs(out - ref)))
    assert jnp.allclose(out_f32, ref, atol=5e-3, rtol=5e-3), \
        f"f32 path mismatch vs reference (max abs err {err32})"
    assert jnp.allclose(out, ref, atol=2.5e-2, rtol=2.5e-2), \
        f"bf16 path mismatch vs reference (max abs err {errbf})"

    print("KERNEL_OK")
</pallas_src>

<mosaic_0001>
module attributes {stable_mosaic.version = 11 : i64} {
  func.func @k(%arg0: memref<8x256xf32, #tpu.memory_space<vmem>>, %arg1: memref<8x256xf32, #tpu.memory_space<vmem>>) attributes {dimension_semantics = [], scalar_prefetch = 0 : i64, scratch_operands = 0 : i64, tpu.core_type = #tpu.core_type<tc>} {
    %c0 = arith.constant 0 : index
    %c0_0 = arith.constant 0 : index
    %0 = vector.load %arg0[%c0, %c0_0] : memref<8x256xf32, #tpu.memory_space<vmem>>, vector<8x256xf32>
    %c3_i32 = arith.constant 3 : i32
    %1 = tpu.dynamic_rotate %0 by %c3_i32 dim 1 : vector<8x256xf32>, i32 -> vector<8x256xf32>
    %c0_1 = arith.constant 0 : index
    %c0_2 = arith.constant 0 : index
    %2 = vector.load %arg1[%c0_1, %c0_2] : memref<8x256xf32, #tpu.memory_space<vmem>>, vector<8x256xf32>
    tpu.vector_store %arg1[%c0_1, %c0_2], %1 {strides = array<i32>} : memref<8x256xf32, #tpu.memory_space<vmem>>, vector<8x256xf32>,
    return
  }
}

module attributes {stable_mosaic.version = 11 : i64} {
  func.func @_branch0_shortcut_kernel(%arg0: i32, %arg1: i32, %arg2: memref<1x4x256xf32, #tpu.memory_space<vmem>>, %arg3: memref<4x1xf32, #tpu.memory_space<vmem>>, %arg4: memref<4x1xf32, #tpu.memory_space<vmem>>, %arg5: memref<4x1xf32, #tpu.memory_space<vmem>>, %arg6: memref<4x1xf32, #tpu.memory_space<vmem>>, %arg7: memref<8x4xbf16, #tpu.memory_space<vmem>>, %arg8: memref<16x4xbf16, #tpu.memory_space<vmem>>, %arg9: memref<1x8x256xf32, #tpu.memory_space<vmem>>, %arg10: memref<1x16x256xf32, #tpu.memory_space<vmem>>) attributes {dimension_semantics = [#tpu.dimension_semantics<parallel>, #tpu.dimension_semantics<parallel>], iteration_bounds = array<i64: 2, 1>, scalar_prefetch = 0 : i64, scratch_operands = 0 : i64, tpu.core_type = #tpu.core_type<tc>, window_params = [{transform_indices = @transform_0, window_bounds = array<i64: 1, 4, 256>}, {pipeline_mode = #tpu.pipeline_mode<synchronous>, transform_indices = @transform_1, window_bounds = array<i64: 4, 1>}, {pipeline_mode = #tpu.pipeline_mode<synchronous>, transform_indices = @transform_2, window_bounds = array<i64: 4, 1>}, {pipeline_mode = #tpu.pipeline_mode<synchronous>, transform_indices = @transform_3, window_bounds = array<i64: 4, 1>}, {pipeline_mode = #tpu.pipeline_mode<synchronous>, transform_indices = @transform_4, window_bounds = array<i64: 4, 1>}, {pipeline_mode = #tpu.pipeline_mode<synchronous>, transform_indices = @transform_5, window_bounds = array<i64: 8, 4>}, {pipeline_mode = #tpu.pipeline_mode<synchronous>, transform_indices = @transform_6, window_bounds = array<i64: 16, 4>}, {transform_indices = @transform_7, window_bounds = array<i64: 1, 8, 256>}, {transform_indices = @transform_8, window_bounds = array<i64: 1, 16, 256>}]} {
    %c0 = arith.constant 0 : index
    %c0_0 = arith.constant 0 : index
    %c0_1 = arith.constant 0 : index
    %0 = vector.load %arg2[%c0, %c0_0, %c0_1] : memref<1x4x256xf32, #tpu.memory_space<vmem>>, vector<1x4x256xf32>
    %1 = vector.shape_cast %0 : vector<1x4x256xf32> to vector<4x256xf32>
    %c0_2 = arith.constant 0 : index
    %c0_3 = arith.constant 0 : index
    %2 = vector.load %arg3[%c0_2, %c0_3] : memref<4x1xf32, #tpu.memory_space<vmem>>, vector<4x1xf32>
    %3 = vector.broadcast %2 : vector<4x1xf32> to vector<4x256xf32>
    %4 = arith.mulf %1, %3 : vector<4x256xf32>
    %c0_4 = arith.constant 0 : index
    %c0_5 = arith.constant 0 : index
    %5 = vector.load %arg4[%c0_4, %c0_5] : memref<4x1xf32, #tpu.memory_space<vmem>>, vector<4x1xf32>
    %6 = vector.broadcast %5 : vector<4x1xf32> to vector<4x256xf32>
    %7 = arith.addf %4, %6 : vector<4x256xf32>
    %cst = arith.constant 0.000000e+00 : f32
    %8 = vector.broadcast %cst : f32 to vector<4x256xf32>
    %9 = arith.maximumf %7, %8 : vector<4x256xf32>
    %10 = arith.truncf %9 : vector<4x256xf32> to vector<4x256xbf16>
    %c0_6 = arith.constant 0 : index
    %c0_7 = arith.constant 0 : index
    %11 = vector.load %arg5[%c0_6, %c0_7] : memref<4x1xf32, #tpu.memory_space<vmem>>, vector<4x1xf32>
    %12 = vector.broadcast %11 : vector<4x1xf32> to vector<4x256xf32>
    %13 = arith.mulf %1, %12 : vector<4x256xf32>
    %c0_8 = arith.constant 0 : index
    %c0_9 = arith.constant 0 : index
    %14 = vector.load %arg6[%c0_8, %c0_9] : memref<4x1xf32, #tpu.memory_space<vmem>>, vector<4x1xf32>
    %15 = vector.broadcast %14 : vector<4x1xf32> to vector<4x256xf32>
    %16 = arith.addf %13, %15 : vector<4x256xf32>
    %cst_10 = arith.constant 0.000000e+00 : f32
    %17 = vector.broadcast %cst_10 : f32 to vector<4x256xf32>
    %18 = arith.maximumf %16, %17 : vector<4x256xf32>
    %19 = arith.truncf %18 : vector<4x256xf32> to vector<4x256xbf16>
    %c0_11 = arith.constant 0 : index
    %c0_12 = arith.constant 0 : index
    %20 = vector.load %arg7[%c0_11, %c0_12] : memref<8x4xbf16, #tpu.memory_space<vmem>>, vector<8x4xbf16>
    %cst_13 = arith.constant dense<0.000000e+00> : vector<8x256xf32>
    %21 = tpu.matmul %20, %10, %cst_13 {dimension_numbers = #tpu.dot_dimension_numbers<[1], [0], [0], [1], [0, 0, 1, 1], [], []>} : vector<8x4xbf16>, vector<4x256xbf16>, vector<8x256xf32> -> vector<8x256xf32>
    %c0_14 = arith.constant 0 : index
    %c0_15 = arith.constant 0 : index
    %c0_16 = arith.constant 0 : index
    %22 = vector.load %arg9[%c0_14, %c0_15, %c0_16] : memref<1x8x256xf32, #tpu.memory_space<vmem>>, vector<1x8x256xf32>
    %23 = vector.shape_cast %22 : vector<1x8x256xf32> to vector<8x256xf32>
    %24 = vector.shape_cast %21 : vector<8x256xf32> to vector<1x8x256xf32>
    tpu.vector_store %arg9[%c0_14, %c0_15, %c0_16], %24 {strides = array<i32>} : memref<1x8x256xf32, #tpu.memory_space<vmem>>, vector<1x8x256xf32>,
    %c0_17 = arith.constant 0 : index
    %c0_18 = arith.constant 0 : index
    %25 = vector.load %arg8[%c0_17, %c0_18] : memref<16x4xbf16, #tpu.memory_space<vmem>>, vector<16x4xbf16>
    %cst_19 = arith.constant dense<0.000000e+00> : vector<16x256xf32>
    %26 = tpu.matmul %25, %19, %cst_19 {dimension_numbers = #tpu.dot_dimension_numbers<[1], [0], [0], [1], [0, 0, 1, 1], [], []>} : vector<16x4xbf16>, vector<4x256xbf16>, vector<16x256xf32> -> vector<16x256xf32>
    %c0_20 = arith.constant 0 : index
    %c0_21 = arith.constant 0 : index
    %c0_22 = arith.constant 0 : index
    %27 = vector.load %arg10[%c0_20, %c0_21, %c0_22] : memref<1x16x256xf32, #tpu.memory_space<vmem>>, vector<1x16x256xf32>
    %28 = vector.shape_cast %27 : vector<1x16x256xf32> to vector<16x256xf32>
    %29 = vector.shape_cast %26 : vector<16x256xf32> to vector<1x16x256xf32>
    tpu.vector_store %arg10[%c0_20, %c0_21, %c0_22], %29 {strides = array<i32>} : memref<1x16x256xf32, #tpu.memory_space<vmem>>, vector<1x16x256xf32>,
    return
  }
  func.func @transform_0(%arg0: i32, %arg1: i32) -> (i32, i32, i32) {
    %c0_i32 = arith.constant 0 : i32
    %c0_i32_0 = arith.constant 0 : i32
    return %arg0, %c0_i32, %arg1 : i32, i32, i32
  }
  func.func @transform_1(%arg0: i32, %arg1: i32) -> (i32, i32) {
    %c0_i32 = arith.constant 0 : i32
    %c0_i32_0 = arith.constant 0 : i32
    %c0_i32_1 = arith.constant 0 : i32
    return %c0_i32, %c0_i32_0 : i32, i32
  }
  func.func @transform_2(%arg0: i32, %arg1: i32) -> (i32, i32) {
    %c0_i32 = arith.constant 0 : i32
    %c0_i32_0 = arith.constant 0 : i32
    %c0_i32_1 = arith.constant 0 : i32
    return %c0_i32, %c0_i32_0 : i32, i32
  }
  func.func @transform_3(%arg0: i32, %arg1: i32) -> (i32, i32) {
    %c0_i32 = arith.constant 0 : i32
    %c0_i32_0 = arith.constant 0 : i32
    %c0_i32_1 = arith.constant 0 : i32
    return %c0_i32, %c0_i32_0 : i32, i32
  }
  func.func @transform_4(%arg0: i32, %arg1: i32) -> (i32, i32) {
    %c0_i32 = arith.constant 0 : i32
    %c0_i32_0 = arith.constant 0 : i32
    %c0_i32_1 = arith.constant 0 : i32
    return %c0_i32, %c0_i32_0 : i32, i32
  }
  func.func @transform_5(%arg0: i32, %arg1: i32) -> (i32, i32) {
    %c0_i32 = arith.constant 0 : i32
    %c0_i32_0 = arith.constant 0 : i32
    %c0_i32_1 = arith.constant 0 : i32
    return %c0_i32, %c0_i32_0 : i32, i32
  }
  func.func @transform_6(%arg0: i32, %arg1: i32) -> (i32, i32) {
    %c0_i32 = arith.constant 0 : i32
    %c0_i32_0 = arith.constant 0 : i32
    %c0_i32_1 = arith.constant 0 : i32
    return %c0_i32, %c0_i32_0 : i32, i32
  }
  func.func @transform_7(%arg0: i32, %arg1: i32) -> (i32, i32, i32) {
    %c0_i32 = arith.constant 0 : i32
    %c0_i32_0 = arith.constant 0 : i32
    return %arg0, %c0_i32, %arg1 : i32, i32, i32
  }
  func.func @transform_8(%arg0: i32, %arg1: i32) -> (i32, i32, i32) {
    %c0_i32 = arith.constant 0 : i32
    %c0_i32_0 = arith.constant 0 : i32
    return %arg0, %c0_i32, %arg1 : i32, i32, i32
  }
}

module attributes {stable_mosaic.version = 11 : i64} {
  func.func @kernel(%arg0: i32, %arg1: i32, %arg2: memref<1x1x8x256xf32, #tpu.memory_space<vmem>>, %arg3: memref<1x8x256xf32, #tpu.memory_space<vmem>>, %arg4: memref<1x16x256xf32, #tpu.memory_space<vmem>>, %arg5: memref<9x256xf32, #tpu.memory_space<vmem>>, %arg6: memref<1x8x1xf32, #tpu.memory_space<vmem>>, %arg7: memref<1x8x1xf32, #tpu.memory_space<vmem>>, %arg8: memref<1x9x8x8xbf16, #tpu.memory_space<vmem>>, %arg9: memref<1x8x1xf32, #tpu.memory_space<vmem>>, %arg10: memref<1x8x1xf32, #tpu.memory_space<vmem>>, %arg11: memref<1x16x8xbf16, #tpu.memory_space<vmem>>, %arg12: memref<1x16x256xf32, #tpu.memory_space<vmem>>, %arg13: memref<16x256xf32, #tpu.memory_space<vmem>>) attributes {dimension_semantics = [#tpu.dimension_semantics<parallel>, #tpu.dimension_semantics<arbitrary>], iteration_bounds = array<i64: 2, 5>, scalar_prefetch = 0 : i64, scratch_operands = 1 : i64, tpu.core_type = #tpu.core_type<tc>, window_params = [{transform_indices = @transform_0, window_bounds = array<i64: 1, 1, 8, 256>}, {transform_indices = @transform_1, window_bounds = array<i64: 1, 8, 256>}, {transform_indices = @transform_2, window_bounds = array<i64: 1, 16, 256>}, {pipeline_mode = #tpu.pipeline_mode<synchronous>, transform_indices = @transform_3, window_bounds = array<i64: 9, 256>}, {transform_indices = @transform_4, window_bounds = array<i64: 1, 8, 1>}, {transform_indices = @transform_5, window_bounds = array<i64: 1, 8, 1>}, {transform_indices = @transform_6, window_bounds = array<i64: 1, 9, 8, 8>}, {transform_indices = @transform_7, window_bounds = array<i64: 1, 8, 1>}, {transform_indices = @transform_8, window_bounds = array<i64: 1, 8, 1>}, {transform_indices = @transform_9, window_bounds = array<i64: 1, 16, 8>}, {transform_indices = @transform_10, window_bounds = array<i64: 1, 16, 256>}]} {
    %c0_i32 = arith.constant 0 : i32
    %0 = arith.cmpi eq, %arg1, %c0_i32 : i32
    %1 = arith.extui %0 : i1 to i32
    %c0_i32_0 = arith.constant 0 : i32
    %2 = arith.cmpi ne, %1, %c0_i32_0 : i32
    scf.if %2 {
      %c0 = arith.constant 0 : index
      %c0_4 = arith.constant 0 : index
      %c0_5 = arith.constant 0 : index
      %9 = vector.load %arg3[%c0, %c0_4, %c0_5] : memref<1x8x256xf32, #tpu.memory_space<vmem>>, vector<1x8x256xf32>
      %10 = vector.shape_cast %9 : vector<1x8x256xf32> to vector<8x256xf32>
      %c0_6 = arith.constant 0 : index
      %c0_7 = arith.constant 0 : index
      %c0_8 = arith.constant 0 : index
      %11 = vector.load %arg9[%c0_6, %c0_7, %c0_8] : memref<1x8x1xf32, #tpu.memory_space<vmem>>, vector<1x8x1xf32>
      %12 = vector.shape_cast %11 : vector<1x8x1xf32> to vector<8x1xf32>
      %13 = vector.broadcast %12 : vector<8x1xf32> to vector<8x256xf32>
      %14 = arith.mulf %10, %13 : vector<8x256xf32>
      %c0_9 = arith.constant 0 : index
      %c0_10 = arith.constant 0 : index
      %c0_11 = arith.constant 0 : index
      %15 = vector.load %arg10[%c0_9, %c0_10, %c0_11] : memref<1x8x1xf32, #tpu.memory_space<vmem>>, vector<1x8x1xf32>
      %16 = vector.shape_cast %15 : vector<1x8x1xf32> to vector<8x1xf32>
      %17 = vector.broadcast %16 : vector<8x1xf32> to vector<8x256xf32>
      %18 = arith.addf %14, %17 : vector<8x256xf32>
      %cst = arith.constant 0.000000e+00 : f32
      %19 = vector.broadcast %cst : f32 to vector<8x256xf32>
      %20 = arith.maximumf %18, %19 : vector<8x256xf32>
      %21 = arith.truncf %20 : vector<8x256xf32> to vector<8x256xbf16>
      %c0_12 = arith.constant 0 : index
      %c0_13 = arith.constant 0 : index
      %c0_14 = arith.constant 0 : index
      %22 = vector.load %arg4[%c0_12, %c0_13, %c0_14] : memref<1x16x256xf32, #tpu.memory_space<vmem>>, vector<1x16x256xf32>
      %23 = vector.shape_cast %22 : vector<1x16x256xf32> to vector<16x256xf32>
      %c0_15 = arith.constant 0 : index
      %c0_16 = arith.constant 0 : index
      %c0_17 = arith.constant 0 : index
      %24 = vector.load %arg11[%c0_15, %c0_16, %c0_17] : memref<1x16x8xbf16, #tpu.memory_space<vmem>>, vector<1x16x8xbf16>
      %25 = vector.shape_cast %24 : vector<1x16x8xbf16> to vector<16x8xbf16>
      %cst_18 = arith.constant dense<0.000000e+00> : vector<16x256xf32>
      %26 = tpu.matmul %25, %21, %cst_18 {dimension_numbers = #tpu.dot_dimension_numbers<[1], [0], [0], [1], [0, 0, 1, 1], [], []>} : vector<16x8xbf16>, vector<8x256xbf16>, vector<16x256xf32> -> vector<16x256xf32>
      %27 = arith.addf %23, %26 : vector<16x256xf32>
      %c0_19 = arith.constant 0 : index
      %c0_20 = arith.constant 0 : index
      %28 = vector.load %arg13[%c0_19, %c0_20] : memref<16x256xf32, #tpu.memory_space<vmem>>, vector<16x256xf32>
      tpu.vector_store %arg13[%c0_19, %c0_20], %27 {strides = array<i32>} : memref<16x256xf32, #tpu.memory_space<vmem>>, vector<16x256xf32>,
    } else {
    }
    %c0_i32_1 = arith.constant 0 : i32
    %3 = arith.cmpi sgt, %arg1, %c0_i32_1 : i32
    %4 = arith.extui %3 : i1 to i32
    %c0_i32_2 = arith.constant 0 : i32
    %5 = arith.cmpi ne, %4, %c0_i32_2 : i32
    scf.if %5 {
      %c0 = arith.constant 0 : index
      %c0_4 = arith.constant 0 : index
      %c0_5 = arith.constant 0 : index
      %c0_6 = arith.constant 0 : index
      %9 = vector.load %arg2[%c0, %c0_4, %c0_5, %c0_6] : memref<1x1x8x256xf32, #tpu.memory_space<vmem>>, vector<1x1x8x256xf32>
      %10 = vector.shape_cast %9 : vector<1x1x8x256xf32> to vector<8x256xf32>
      %c0_7 = arith.constant 0 : index
      %c0_8 = arith.constant 0 : index
      %c0_9 = arith.constant 0 : index
      %11 = vector.load %arg3[%c0_7, %c0_8, %c0_9] : memref<1x8x256xf32, #tpu.memory_space<vmem>>, vector<1x8x256xf32>
      %12 = vector.shape_cast %11 : vector<1x8x256xf32> to vector<8x256xf32>
      %13 = arith.addf %10, %12 : vector<8x256xf32>
      %c0_10 = arith.constant 0 : index
      %c0_11 = arith.constant 0 : index
      %c0_12 = arith.constant 0 : index
      %14 = vector.load %arg6[%c0_10, %c0_11, %c0_12] : memref<1x8x1xf32, #tpu.memory_space<vmem>>, vector<1x8x1xf32>
      %15 = vector.shape_cast %14 : vector<1x8x1xf32> to vector<8x1xf32>
      %16 = vector.broadcast %15 : vector<8x1xf32> to vector<8x256xf32>
      %17 = arith.mulf %13, %16 : vector<8x256xf32>
      %c0_13 = arith.constant 0 : index
      %c0_14 = arith.constant 0 : index
      %c0_15 = arith.constant 0 : index
      %18 = vector.load %arg7[%c0_13, %c0_14, %c0_15] : memref<1x8x1xf32, #tpu.memory_space<vmem>>, vector<1x8x1xf32>
      %19 = vector.shape_cast %18 : vector<1x8x1xf32> to vector<8x1xf32>
      %20 = vector.broadcast %19 : vector<8x1xf32> to vector<8x256xf32>
      %21 = arith.addf %17, %20 : vector<8x256xf32>
      %cst = arith.constant 0.000000e+00 : f32
      %22 = vector.broadcast %cst : f32 to vector<8x256xf32>
      %23 = arith.maximumf %21, %22 : vector<8x256xf32>
      %c0_16 = arith.constant 0 : index
      %c0_17 = arith.constant 0 : index
      %24 = vector.load %arg5[%c0_16, %c0_17] : memref<9x256xf32, #tpu.memory_space<vmem>>, vector<9x256xf32>
      %c0_18 = arith.constant 0 : index
      %c0_19 = arith.constant 0 : index
      %c0_20 = arith.constant 0 : index
      %c0_21 = arith.constant 0 : index
      %25 = vector.load %arg8[%c0_18, %c0_19, %c0_20, %c0_21] : memref<1x9x8x8xbf16, #tpu.memory_space<vmem>>, vector<1x9x8x8xbf16>
      %26 = vector.shape_cast %25 : vector<1x9x8x8xbf16> to vector<9x8x8xbf16>
      %cst_22 = arith.constant 0.000000e+00 : f32
      %27 = vector.broadcast %cst_22 : f32 to vector<8x256xf32>
      %c17_i32 = arith.constant 17 : i32
      %28 = tpu.dynamic_rotate %23 by %c17_i32 dim 1 : vector<8x256xf32>, i32 -> vector<8x256xf32>
      %29 = vector.extract_strided_slice %24 {offsets = [0, 0], sizes = [1, 256], strides = [1, 1]} : vector<9x256xf32> to vector<1x256xf32>
      %30 = vector.broadcast %29 : vector<1x256xf32> to vector<8x256xf32>
      %31 = arith.mulf %28, %30 : vector<8x256xf32>
      %32 = arith.truncf %31 : vector<8x256xf32> to vector<8x256xbf16>
      %33 = vector.extract_strided_slice %26 {offsets = [0, 0, 0], sizes = [1, 8, 8], strides = [1, 1, 1]} : vector<9x8x8xbf16> to vector<1x8x8xbf16>
      %34 = vector.shape_cast %33 : vector<1x8x8xbf16> to vector<8x8xbf16>
      %cst_23 = arith.constant dense<0.000000e+00> : vector<8x256xf32>
      %35 = tpu.matmul %34, %32, %cst_23 {dimension_numbers = #tpu.dot_dimension_numbers<[1], [0], [0], [1], [0, 0, 1, 1], [], []>} : vector<8x8xbf16>, vector<8x256xbf16>, vector<8x256xf32> -> vector<8x256xf32>
      %36 = arith.addf %27, %35 : vector<8x256xf32>
      %c16_i32 = arith.constant 16 : i32
      %37 = tpu.dynamic_rotate %23 by %c16_i32 dim 1 : vector<8x256xf32>, i32 -> vector<8x256xf32>
      %38 = vector.extract_strided_slice %24 {offsets = [1, 0], sizes = [1, 256], strides = [1, 1]} : vector<9x256xf32> to vector<1x256xf32>
      %39 = vector.broadcast %38 : vector<1x256xf32> to vector<8x256xf32>
      %40 = arith.mulf %37, %39 : vector<8x256xf32>
      %41 = arith.truncf %40 : vector<8x256xf32> to vector<8x256xbf16>
      %42 = vector.extract_strided_slice %26 {offsets = [1, 0, 0], sizes = [1, 8, 8], strides = [1, 1, 1]} : vector<9x8x8xbf16> to vector<1x8x8xbf16>
      %43 = vector.shape_cast %42 : vector<1x8x8xbf16> to vector<8x8xbf16>
      %cst_24 = arith.constant dense<0.000000e+00> : vector<8x256xf32>
      %44 = tpu.matmul %43, %41, %cst_24 {dimension_numbers = #tpu.dot_dimension_numbers<[1], [0], [0], [1], [0, 0, 1, 1], [], []>} : vector<8x8xbf16>, vector<8x256xbf16>, vector<8x256xf32> -> vector<8x256xf32>
      %45 = arith.addf %36, %44 : vector<8x256xf32>
      %c15_i32 = arith.constant 15 : i32
      %46 = tpu.dynamic_rotate %23 by %c15_i32 dim 1 : vector<8x256xf32>, i32 -> vector<8x256xf32>
      %47 = vector.extract_strided_slice %24 {offsets = [2, 0], sizes = [1, 256], strides = [1, 1]} : vector<9x256xf32> to vector<1x256xf32>
      %48 = vector.broadcast %47 : vector<1x256xf32> to vector<8x256xf32>
      %49 = arith.mulf %46, %48 : vector<8x256xf32>
      %50 = arith.truncf %49 : vector<8x256xf32> to vector<8x256xbf16>
      %51 = vector.extract_strided_slice %26 {offsets = [2, 0, 0], sizes = [1, 8, 8], strides = [1, 1, 1]} : vector<9x8x8xbf16> to vector<1x8x8xbf16>
      %52 = vector.shape_cast %51 : vector<1x8x8xbf16> to vector<8x8xbf16>
      %cst_25 = arith.constant dense<0.000000e+00> : vector<8x256xf32>
      %53 = tpu.matmul %52, %50, %cst_25 {dimension_numbers = #tpu.dot_dimension_numbers<[1], [0], [0], [1], [0, 0, 1, 1], [], []>} : vector<8x8xbf16>, vector<8x256xbf16>, vector<8x256xf32> -> vector<8x256xf32>
      %54 = arith.addf %45, %53 : vector<8x256xf32>
      %c1_i32 = arith.constant 1 : i32
      %55 = tpu.dynamic_rotate %23 by %c1_i32 dim 1 : vector<8x256xf32>, i32 -> vector<8x256xf32>
      %56 = vector.extract_strided_slice %24 {offsets = [3, 0], sizes = [1, 256], strides = [1, 1]} : vector<9x256xf32> to vector<1x256xf32>
      %57 = vector.broadcast %56 : vector<1x256xf32> to vector<8x256xf32>
      %58 = arith.mulf %55, %57 : vector<8x256xf32>
      %59 = arith.truncf %58 : vector<8x256xf32> to vector<8x256xbf16>
      %60 = vector.extract_strided_slice %26 {offsets = [3, 0, 0], sizes = [1, 8, 8], strides = [1, 1, 1]} : vector<9x8x8xbf16> to vector<1x8x8xbf16>
      %61 = vector.shape_cast %60 : vector<1x8x8xbf16> to vector<8x8xbf16>
      %cst_26 = arith.constant dense<0.000000e+00> : vector<8x256xf32>
      %62 = tpu.matmul %61, %59, %cst_26 {dimension_numbers = #tpu.dot_dimension_numbers<[1], [0], [0], [1], [0, 0, 1, 1], [], []>} : vector<8x8xbf16>, vector<8x256xbf16>, vector<8x256xf32> -> vector<8x256xf32>
      %63 = arith.addf %54, %62 : vector<8x256xf32>
      %64 = vector.extract_strided_slice %24 {offsets = [4, 0], sizes = [1, 256], strides = [1, 1]} : vector<9x256xf32> to vector<1x256xf32>
      %65 = vector.broadcast %64 : vector<1x256xf32> to vector<8x256xf32>
      %66 = arith.mulf %23, %65 : vector<8x256xf32>
      %67 = arith.truncf %66 : vector<8x256xf32> to vector<8x256xbf16>
      %68 = vector.extract_strided_slice %26 {offsets = [4, 0, 0], sizes = [1, 8, 8], strides = [1, 1, 1]} : vector<9x8x8xbf16> to vector<1x8x8xbf16>
      %69 = vector.shape_cast %68 : vector<1x8x8xbf16> to vector<8x8xbf16>
      %cst_27 = arith.constant dense<0.000000e+00> : vector<8x256xf32>
      %70 = tpu.matmul %69, %67, %cst_27 {dimension_numbers = #tpu.dot_dimension_numbers<[1], [0], [0], [1], [0, 0, 1, 1], [], []>} : vector<8x8xbf16>, vector<8x256xbf16>, vector<8x256xf32> -> vector<8x256xf32>
      %71 = arith.addf %63, %70 : vector<8x256xf32>
      %c255_i32 = arith.constant 255 : i32
      %72 = tpu.dynamic_rotate %23 by %c255_i32 dim 1 : vector<8x256xf32>, i32 -> vector<8x256xf32>
      %73 = vector.extract_strided_slice %24 {offsets = [5, 0], sizes = [1, 256], strides = [1, 1]} : vector<9x256xf32> to vector<1x256xf32>
      %74 = vector.broadcast %73 : vector<1x256xf32> to vector<8x256xf32>
      %75 = arith.mulf %72, %74 : vector<8x256xf32>
      %76 = arith.truncf %75 : vector<8x256xf32> to vector<8x256xbf16>
      %77 = vector.extract_strided_slice %26 {offsets = [5, 0, 0], sizes = [1, 8, 8], strides = [1, 1, 1]} : vector<9x8x8xbf16> to vector<1x8x8xbf16>
      %78 = vector.shape_cast %77 : vector<1x8x8xbf16> to vector<8x8xbf16>
      %cst_28 = arith.constant dense<0.000000e+00> : vector<8x256xf32>
      %79 = tpu.matmul %78, %76, %cst_28 {dimension_numbers = #tpu.dot_dimension_numbers<[1], [0], [0], [1], [0, 0, 1, 1], [], []>} : vector<8x8xbf16>, vector<8x256xbf16>, vector<8x256xf32> -> vector<8x256xf32>
      %80 = arith.addf %71, %79 : vector<8x256xf32>
      %c241_i32 = arith.constant 241 : i32
      %81 = tpu.dynamic_rotate %23 by %c241_i32 dim 1 : vector<8x256xf32>, i32 -> vector<8x256xf32>
      %82 = vector.extract_strided_slice %24 {offsets = [6, 0], sizes = [1, 256], strides = [1, 1]} : vector<9x256xf32> to vector<1x256xf32>
      %83 = vector.broadcast %82 : vector<1x256xf32> to vector<8x256xf32>
      %84 = arith.mulf %81, %83 : vector<8x256xf32>
      %85 = arith.truncf %84 : vector<8x256xf32> to vector<8x256xbf16>
      %86 = vector.extract_strided_slice %26 {offsets = [6, 0, 0], sizes = [1, 8, 8], strides = [1, 1, 1]} : vector<9x8x8xbf16> to vector<1x8x8xbf16>
      %87 = vector.shape_cast %86 : vector<1x8x8xbf16> to vector<8x8xbf16>
      %cst_29 = arith.constant dense<0.000000e+00> : vector<8x256xf32>
      %88 = tpu.matmul %87, %85, %cst_29 {dimension_numbers = #tpu.dot_dimension_numbers<[1], [0], [0], [1], [0, 0, 1, 1], [], []>} : vector<8x8xbf16>, vector<8x256xbf16>, vector<8x256xf32> -> vector<8x256xf32>
      %89 = arith.addf %80, %88 : vector<8x256xf32>
      %c240_i32 = arith.constant 240 : i32
      %90 = tpu.dynamic_rotate %23 by %c240_i32 dim 1 : vector<8x256xf32>, i32 -> vector<8x256xf32>
      %91 = vector.extract_strided_slice %24 {offsets = [7, 0], sizes = [1, 256], strides = [1, 1]} : vector<9x256xf32> to vector<1x256xf32>
      %92 = vector.broadcast %91 : vector<1x256xf32> to vector<8x256xf32>
      %93 = arith.mulf %90, %92 : vector<8x256xf32>
      %94 = arith.truncf %93 : vector<8x256xf32> to vector<8x256xbf16>
      %95 = vector.extract_strided_slice %26 {offsets = [7, 0, 0], sizes = [1, 8, 8], strides = [1, 1, 1]} : vector<9x8x8xbf16> to vector<1x8x8xbf16>
      %96 = vector.shape_cast %95 : vector<1x8x8xbf16> to vector<8x8xbf16>
      %cst_30 = arith.constant dense<0.000000e+00> : vector<8x256xf32>
      %97 = tpu.matmul %96, %94, %cst_30 {dimension_numbers = #tpu.dot_dimension_numbers<[1], [0], [0], [1], [0, 0, 1, 1], [], []>} : vector<8x8xbf16>, vector<8x256xbf16>, vector<8x256xf32> -> vector<8x256xf32>
      %98 = arith.addf %89, %97 : vector<8x256xf32>
      %c239_i32 = arith.constant 239 : i32
      %99 = tpu.dynamic_rotate %23 by %c239_i32 dim 1 : vector<8x256xf32>, i32 -> vector<8x256xf32>
      %100 = vector.extract_strided_slice %24 {offsets = [8, 0], sizes = [1, 256], strides = [1, 1]} : vector<9x256xf32> to vector<1x256xf32>
      %101 = vector.broadcast %100 : vector<1x256xf32> to vector<8x256xf32>
      %102 = arith.mulf %99, %101 : vector<8x256xf32>
      %103 = arith.truncf %102 : vector<8x256xf32> to vector<8x256xbf16>
      %104 = vector.extract_strided_slice %26 {offsets = [8, 0, 0], sizes = [1, 8, 8], strides = [1, 1, 1]} : vector<9x8x8xbf16> to vector<1x8x8xbf16>
      %105 = vector.shape_cast %104 : vector<1x8x8xbf16> to vector<8x8xbf16>
      %cst_31 = arith.constant dense<0.000000e+00> : vector<8x256xf32>
      %106 = tpu.matmul %105, %103, %cst_31 {dimension_numbers = #tpu.dot_dimension_numbers<[1], [0], [0], [1], [0, 0, 1, 1], [], []>} : vector<8x8xbf16>, vector<8x256xbf16>, vector<8x256xf32> -> vector<8x256xf32>
      %107 = arith.addf %98, %106 : vector<8x256xf32>
      %c0_32 = arith.constant 0 : index
      %c0_33 = arith.constant 0 : index
      %c0_34 = arith.constant 0 : index
      %108 = vector.load %arg9[%c0_32, %c0_33, %c0_34] : memref<1x8x1xf32, #tpu.memory_space<vmem>>, vector<1x8x1xf32>
      %109 = vector.shape_cast %108 : vector<1x8x1xf32> to vector<8x1xf32>
      %110 = vector.broadcast %109 : vector<8x1xf32> to vector<8x256xf32>
      %111 = arith.mulf %107, %110 : vector<8x256xf32>
      %c0_35 = arith.constant 0 : index
      %c0_36 = arith.constant 0 : index
      %c0_37 = arith.constant 0 : index
      %112 = vector.load %arg10[%c0_35, %c0_36, %c0_37] : memref<1x8x1xf32, #tpu.memory_space<vmem>>, vector<1x8x1xf32>
      %113 = vector.shape_cast %112 : vector<1x8x1xf32> to vector<8x1xf32>
      %114 = vector.broadcast %113 : vector<8x1xf32> to vector<8x256xf32>
      %115 = arith.addf %111, %114 : vector<8x256xf32>
      %cst_38 = arith.constant 0.000000e+00 : f32
      %116 = vector.broadcast %cst_38 : f32 to vector<8x256xf32>
      %117 = arith.maximumf %115, %116 : vector<8x256xf32>
      %118 = arith.truncf %117 : vector<8x256xf32> to vector<8x256xbf16>
      %c0_39 = arith.constant 0 : index
      %c0_40 = arith.constant 0 : index
      %119 = vector.load %arg13[%c0_39, %c0_40] : memref<16x256xf32, #tpu.memory_space<vmem>>, vector<16x256xf32>
      %c0_41 = arith.constant 0 : index
      %c0_42 = arith.constant 0 : index
      %c0_43 = arith.constant 0 : index
      %120 = vector.load %arg11[%c0_41, %c0_42, %c0_43] : memref<1x16x8xbf16, #tpu.memory_space<vmem>>, vector<1x16x8xbf16>
      %121 = vector.shape_cast %120 : vector<1x16x8xbf16> to vector<16x8xbf16>
      %cst_44 = arith.constant dense<0.000000e+00> : vector<16x256xf32>
      %122 = tpu.matmul %121, %118, %cst_44 {dimension_numbers = #tpu.dot_dimension_numbers<[1], [0], [0], [1], [0, 0, 1, 1], [], []>} : vector<16x8xbf16>, vector<8x256xbf16>, vector<16x256xf32> -> vector<16x256xf32>
      %123 = arith.addf %119, %122 : vector<16x256xf32>
      %c0_45 = arith.constant 0 : index
      %c0_46 = arith.constant 0 : index
      %124 = vector.load %arg13[%c0_45, %c0_46] : memref<16x256xf32, #tpu.memory_space<vmem>>, vector<16x256xf32>
      tpu.vector_store %arg13[%c0_45, %c0_46], %123 {strides = array<i32>} : memref<16x256xf32, #tpu.memory_space<vmem>>, vector<16x256xf32>,
    } else {
    }
    %c4_i32 = arith.constant 4 : i32
    %6 = arith.cmpi eq, %arg1, %c4_i32 : i32
    %7 = arith.extui %6 : i1 to i32
    %c0_i32_3 = arith.constant 0 : i32
    %8 = arith.cmpi ne, %7, %c0_i32_3 : i32
    scf.if %8 {
      %c0 = arith.constant 0 : index
      %c0_4 = arith.constant 0 : index
      %9 = vector.load %arg13[%c0, %c0_4] : memref<16x256xf32, #tpu.memory_space<vmem>>, vector<16x256xf32>
      %c0_5 = arith.constant 0 : index
      %c0_6 = arith.constant 0 : index
      %c0_7 = arith.constant 0 : index
      %10 = vector.load %arg12[%c0_5, %c0_6, %c0_7] : memref<1x16x256xf32, #tpu.memory_space<vmem>>, vector<1x16x256xf32>
      %11 = vector.shape_cast %10 : vector<1x16x256xf32> to vector<16x256xf32>
      %12 = vector.shape_cast %9 : vector<16x256xf32> to vector<1x16x256xf32>
      tpu.vector_store %arg12[%c0_5, %c0_6, %c0_7], %12 {strides = array<i32>} : memref<1x16x256xf32, #tpu.memory_space<vmem>>, vector<1x16x256xf32>,
    } else {
    }
    return
  }
  func.func @transform_0(%arg0: i32, %arg1: i32) -> (i32, i32, i32, i32) {
    %c1_i32 = arith.constant 1 : i32
    %0 = arith.subi %arg1, %c1_i32 : i32
    %c0_i32 = arith.constant 0 : i32
    %1 = arith.maxsi %0, %c0_i32 : i32
    %c0_i32_0 = arith.constant 0 : i32
    %c0_i32_1 = arith.constant 0 : i32
    %c0_i32_2 = arith.constant 0 : i32
    return %arg0, %1, %c0_i32_0, %c0_i32_1 : i32, i32, i32, i32
  }
  func.func @transform_1(%arg0: i32, %arg1: i32) -> (i32, i32, i32) {
    %c0_i32 = arith.constant 0 : i32
    %c0_i32_0 = arith.constant 0 : i32
    %c0_i32_1 = arith.constant 0 : i32
    return %arg0, %c0_i32, %c0_i32_0 : i32, i32, i32
  }
  func.func @transform_2(%arg0: i32, %arg1: i32) -> (i32, i32, i32) {
    %c0_i32 = arith.constant 0 : i32
    %c0_i32_0 = arith.constant 0 : i32
    %c0_i32_1 = arith.constant 0 : i32
    return %arg0, %c0_i32, %c0_i32_0 : i32, i32, i32
  }
  func.func @transform_3(%arg0: i32, %arg1: i32) -> (i32, i32) {
    %c0_i32 = arith.constant 0 : i32
    %c0_i32_0 = arith.constant 0 : i32
    %c0_i32_1 = arith.constant 0 : i32
    return %c0_i32, %c0_i32_0 : i32, i32
  }
  func.func @transform_4(%arg0: i32, %arg1: i32) -> (i32, i32, i32) {
    %c1_i32 = arith.constant 1 : i32
    %0 = arith.subi %arg1, %c1_i32 : i32
    %c0_i32 = arith.constant 0 : i32
    %1 = arith.maxsi %0, %c0_i32 : i32
    %c0_i32_0 = arith.constant 0 : i32
    %c0_i32_1 = arith.constant 0 : i32
    %c0_i32_2 = arith.constant 0 : i32
    return %1, %c0_i32_0, %c0_i32_1 : i32, i32, i32
  }
  func.func @transform_5(%arg0: i32, %arg1: i32) -> (i32, i32, i32) {
    %c1_i32 = arith.constant 1 : i32
    %0 = arith.subi %arg1, %c1_i32 : i32
    %c0_i32 = arith.constant 0 : i32
    %1 = arith.maxsi %0, %c0_i32 : i32
    %c0_i32_0 = arith.constant 0 : i32
    %c0_i32_1 = arith.constant 0 : i32
    %c0_i32_2 = arith.constant 0 : i32
    return %1, %c0_i32_0, %c0_i32_1 : i32, i32, i32
  }
  func.func @transform_6(%arg0: i32, %arg1: i32) -> (i32, i32, i32, i32) {
    %c1_i32 = arith.constant 1 : i32
    %0 = arith.subi %arg1, %c1_i32 : i32
    %c0_i32 = arith.constant 0 : i32
    %1 = arith.maxsi %0, %c0_i32 : i32
    %c0_i32_0 = arith.constant 0 : i32
    %c0_i32_1 = arith.constant 0 : i32
    %c0_i32_2 = arith.constant 0 : i32
    %c0_i32_3 = arith.constant 0 : i32
    return %1, %c0_i32_0, %c0_i32_1, %c0_i32_2 : i32, i32, i32, i32
  }
  func.func @transform_7(%arg0: i32, %arg1: i32) -> (i32, i32, i32) {
    %c0_i32 = arith.constant 0 : i32
    %c0_i32_0 = arith.constant 0 : i32
    %c0_i32_1 = arith.constant 0 : i32
    return %arg1, %c0_i32, %c0_i32_0 : i32, i32, i32
  }
  func.func @transform_8(%arg0: i32, %arg1: i32) -> (i32, i32, i32) {
    %c0_i32 = arith.constant 0 : i32
    %c0_i32_0 = arith.constant 0 : i32
    %c0_i32_1 = arith.constant 0 : i32
    return %arg1, %c0_i32, %c0_i32_0 : i32, i32, i32
  }
  func.func @transform_9(%arg0: i32, %arg1: i32) -> (i32, i32, i32) {
    %c0_i32 = arith.constant 0 : i32
    %c0_i32_0 = arith.constant 0 : i32
    %c0_i32_1 = arith.constant 0 : i32
    return %arg1, %c0_i32, %c0_i32_0 : i32, i32, i32
  }
  func.func @transform_10(%arg0: i32, %arg1: i32) -> (i32, i32, i32) {
    %c0_i32 = arith.constant 0 : i32
    %c0_i32_0 = arith.constant 0 : i32
    %c0_i32_1 = arith.constant 0 : i32
    return %arg0, %c0_i32, %c0_i32_0 : i32, i32, i32
  }
}

</mosaic_0001>

<bundles_post_ra>
// kernel: tpu_custom_call.1
= control target key start
LH: loop header
LB: loop body
LE: loop exit
PB: predicated region body
PF: predicated region fallthrough
CT: control target
= control target key end

     0   :  { %6 = vsyncpa [#allocation3], 0  ;;  %s137_s0 = inlined_call_operand.hbm [shape: f32[8,256], index: 0, kind: input, shape index: {}]   ;;  %s138_s1 = inlined_call_operand.hbm [shape: f32[8,256], index: 1, kind: output, shape index: {}]  }
   0x1   :  { %7 = vsyncpa [#allocation4], 0  ;;  %s100_s6 = smov [#allocation2]   ;;  %s52_s10 = scalar_lea.hbm %s137_s0, 256 }
   0x2   :  { %s14_s7 = sshll.u32 %s100_s6, 4  ;;  %p53_p0 = scmp.ne.s32.totalorder %s137_s0, %s52_s10  ;;  %s15_s7 = int_to_ptr.vmem [resolvable:$true] %s14_s7 }
   0x3   :  { %p56_p1 = scmp.lt.u32.totalorder %s52_s10, %s137_s0 }
   0x5   :  { %p58_p2 = pnand %p56_p1, %p53_p0 }
   0x7   :  { %61 = shalt.err (!%p58_p2)
}
   0x8   :  { %s62_s15 = scalar_lea.vmem %s15_s7, 256  ;;  %p67_p4 = scmp.lt.s32.totalorder %s15_s7, %s15_s7 }
   0x9   :  { %p63_p3 = scmp.ne.s32.totalorder %s15_s7, %s62_s15  ;;  %p68_p5 = scmp.lt.s32.totalorder %s62_s15, %s62_s15 }
   0xb   :  { %p69_p6 = por %p68_p5, %p67_p4 }
   0xd   :  { %p70_p7 = pnand %p69_p6, %p63_p3 }
   0xf   :  { %73 = shalt.err (!%p70_p7)
}
  0x10   :  { %17 = dma.hbm_to_vmem [thread:$0]  %s137_s0, 256, %s15_s7, [#allocation3]  }
  0x11   :  { %96 = dma.done.wait [#allocation3], 256  }
  0x12   :  { %97 = vsyncadd [#allocation3], 4294967040  ;;  %v21_v0 = vld [vmem:[#allocation2] sm:$0xff]  ;;  %s101_s18 = smov 3   ;;  %v22_v1 = vld [vmem:[#allocation2 + $0x8] sm:$0xff]  ;;  %v27_v2 = vlaneseq  ;;  %s102_s19 = smov [#allocation5]  }
  0x13   :  { %23 = vrot.lane.b32.xlu0 %v21_v0, %s101_s18  ;;  %s40_s20 = sshll.u32 %s102_s19, 4  ;;  %s41_s20 = int_to_ptr.vmem [resolvable:$true] %s40_s20 }
  0x14   :  { %v28_v3 = vand.u32 127, %v27_v2  ;;  %s74_s0 = scalar_lea.vmem %s41_s20, 256  ;;  %p79_p9 = scmp.lt.s32.totalorder %s41_s20, %s41_s20 }
  0x15   :  { %p75_p8 = scmp.ne.s32.totalorder %s41_s20, %s74_s0  ;;  %p80_p10 = scmp.lt.s32.totalorder %s74_s0, %s74_s0 }
  0x16   :  { %vm29_vm0 = vcmp.lt.s32.totalorder %v28_v3, 3 }
  0x17   :  { %25 = vrot.lane.b32.xlu0 %v22_v1, %s101_s18  ;;  %p81_p11 = por %p80_p10, %p79_p9 }
  0x19   :  { %p82_p12 = pnand %p81_p11, %p75_p8 }
  0x85   :  { %v24_v4 = vpop.permute.xlu0 %23 }
  0x89   :  { %v26_v5 = vpop.permute.xlu0 %25 }
  0x8a   :  { %v30_v6 = vsel %vm29_vm0, %v24_v4, %v26_v5  ;;  %v31_v7 = vsel %vm29_vm0, %v26_v5, %v24_v4 }
  0x8b   :  { %32 = vst [vmem:[#allocation5] sm:$0xff] %v31_v7  ;;  %33 = vst [vmem:[#allocation5 + $0x8] sm:$0xff] %v30_v6 }
  0x8c   :  { %85 = shalt.err (!%p82_p12)
}
  0x8d   :  { %s86_s23 = scalar_lea.hbm %s138_s1, 256 }
  0x8e   :  { %p87_p13 = scmp.ne.s32.totalorder %s138_s1, %s86_s23  ;;  %p90_p0 = scmp.lt.u32.totalorder %s86_s23, %s138_s1 }
  0x90   :  { %p92_p1 = pnand %p90_p0, %p87_p13 }
  0x92   :  { %95 = shalt.err (!%p92_p1)
}
  0x93   :  { %43 = dma.vmem_to_hbm [thread:$0]  %s41_s20, 256, %s138_s1, [#allocation4]  }
  0x94   :  { %98 = dma.done.wait [#allocation4], 256  }
  0x95   :  { %99 = vsyncadd [#allocation4], 4294967040 }
  0x96   :  { %47 = vsyncpa [#allocation3], 1 }
  0x97   :  { %48 = vsyncpa [#allocation4], 1 }

// kernel: dappm_forward.2
= control target key start
LH: loop header
LB: loop body
LE: loop exit
PB: predicated region body
PF: predicated region fallthrough
CT: control target
= control target key end

     0   :  { %s815_s27 = smov 0   ;;  %s817_s28 = smov 0   ;;  %s874_s0 = inlined_call_operand.vmem [shape: f32[2,4,256], index: 0, kind: input, shape index: {}]   ;;  %s875_s1 = inlined_call_operand.vmem [shape: f32[4,1], index: 1, kind: input, shape index: {}]   ;;  %s876_s2 = inlined_call_operand.vmem [shape: f32[4,1], index: 2, kind: input, shape index: {}]   ;;  %s877_s3 = inlined_call_operand.vmem [shape: f32[4,1], index: 3, kind: input, shape index: {}]   ;;  %s878_s4 = inlined_call_operand.vmem [shape: f32[4,1], index: 4, kind: input, shape index: {}]   ;;  %s879_s5 = inlined_call_operand.vmem [shape: bf16[8,4], index: 5, kind: input, shape index: {}]   ;;  %s880_s6 = inlined_call_operand.vmem [shape: bf16[16,4], index: 6, kind: input, shape index: {}]   ;;  %s881_s7 = inlined_call_operand.vmem [shape: f32[2,8,256], index: 7, kind: output, shape index: {0}]   ;;  %s882_s8 = inlined_call_operand.vmem [shape: f32[2,16,256], index: 8, kind: output, shape index: {1}]  }
   0x1   :  { %s819_s29 = smov 0  }
   0x2 LB: > { %s31_s30 = sadd.s32 1, %s762_s28  ;;  %p698_p0 = scmp.ge.s32.totalorder %s766_s29, 1  ;;  %s766_s29 = sphi %s819_s29, %s19_s29   ;;  %s762_s28 = sphi %s817_s28, %s884_s28   ;;  %s758_s27 = sphi %s815_s27, %s883_s27  }
   0x3   : > { %p33_p1 = scmp.ge.s32.totalorder %s31_s30, 2  ;;  %p288_p2 = scmp.lt.s32.totalorder %s766_s29, 3 }
   0x5   : > { %s886_s30 = smov (%p33_p1, %s31_s30), 0  ;;  %p289_p3 = pnand %p698_p0, %p288_p2 }
   0x6   : > { %v419_v0 = vld [vmem:[%s878_s4] sm:$0xf] (!%p289_p3)  ;;  %v768_v2 = vmov (!%p289_p3), 0   ;;  %p340_p4 = scmp.lt.s32.totalorder (!%p289_p3), %s758_s27, 1  ;;  %v769_v5 = vmov (!%p289_p3), 839922192   ;;  %v379_v7 = vlaneseq (!%p289_p3) }
   0x7   : > { %292 = sbr.rel (%p289_p3) target bundleno = 371 (0x173), region = 48  ;;  %v405_v1 = vld [vmem:[%s877_s3] sm:$0xf] (!%p289_p3)  ;;  %742 = vset.pattern.permute.xlu1 (!%p289_p3), %v768_v2  ;;  %741 = vset.pattern.permute.xlu0 (!%p289_p3), %v768_v2  ;;  %v377_v6 = vunpack.c.l.s4 (!%p289_p3), %v769_v5  ;;  %vm444_vm0 = vcmask (!%p289_p3), 1041408   ;;  %vm440_vm1 = vcmask (!%p289_p3), 31744  }
   0x8   : > { %422 = vperm.xlu1 (!%p289_p3), %742, %v419_v0   ;;  %408 = vperm.xlu0 (!%p289_p3), %741, %v405_v1   ;;  %v385_v3 = vld [vmem:[%s876_s2] sm:$0xf] (!%p289_p3)  ;;  %v380_v9 = vshrl.u32 (!%p289_p3), %v379_v7, 7 }
   0x9   : > { %v371_v4 = vld [vmem:[%s875_s1] sm:$0xf] (!%p289_p3)  ;;  %542 = vmatprep.mubr.bf16.mxu1 (!%p289_p3), %v768_v2  ;;  %483 = vmatprep.mubr.bf16.mxu0 (!%p289_p3), %v768_v2  ;;  %v378_v8 = vunpack.c.0.s8 (!%p289_p3), %v377_v6 }
   0xa   : > { %v743_v31 = vld [vmem:[%s880_s6] sm:$0xff] (!%p289_p3)  }
   0xb   : > { %v381_v10 = vsub.s32 (!%p289_p3), %v378_v8, %v380_v9  ;;  %v439_v35 = vld [vmem:[%s879_s5] sm:$0xf] (!%p289_p3) }
   0xc   : > { %388 = vperm.xlu1 (!%p289_p3), %742, %v385_v3   ;;  %374 = vperm.xlu0 (!%p289_p3), %741, %v371_v4  }
   0xe   : > { %s888_s27 = smov (!%p340_p4, %s758_s27), 1 }
   0xf   : > { %s712_s17 = sshll.u32 %s888_s27, 3  ;;  %s714_s25 = sshll.u32 %s888_s27, 5 }
  0x10   : > { %s347_s20 = scalar_lea.vmem %s874_s0, %s712_s17  ;;  %s367_s10 = scalar_lea.vmem %s882_s8, %s714_s25 }
  0x11   : > { %v370_v13 = vld [vmem:[%s347_s20] sm:$0xff]  ;;  %s713_s11 = sshll.u32 %s888_s27, 4 }
  0x12   : > { %s357_s14 = scalar_lea.vmem %s881_s7, %s713_s11 }
  0x87   : > { %v423_v11 = vpop.permute.xlu1 %422  ;;  %v409_v12 = vpop.permute.xlu0 %408 }
  0x88   : > { %v430_v14 = vrot.slane %v423_v11, %v381_v10  ;;  %v416_v15 = vrot.slane %v409_v12, %v381_v10 }
  0x8a   : > { %v418_v16 = vmul.f32 %v416_v15, %v370_v13 }
  0x8b   : > { %v389_v17 = vpop.permute.xlu1 %388  ;;  %v375_v18 = vpop.permute.xlu0 %374 }
  0x8c   : > { %v382_v19 = vrot.slane %v375_v18, %v381_v10  ;;  %v432_v20 = vadd.f32 %v430_v14, %v418_v16  ;;  %v396_v21 = vrot.slane %v389_v17, %v381_v10 }
  0x8e   : > { %v384_v22 = vmul.f32 %v382_v19, %v370_v13  ;;  %v433_v23 = vmax.f32 %v432_v20, 0.0 }
  0x90   : > { %v435_v24 = vcombine.high %v433_v23, %v433_v23  ;;  %v437_v25 = vpack.c.bf16 %v433_v23, %v433_v23  ;;  %v398_v26 = vadd.f32 %v396_v21, %v384_v22 }
  0x92   : > { %v438_v27 = vpack.c.bf16 %v435_v24, %v435_v24  ;;  %v399_v28 = vmax.f32 %v398_v26, 0.0  ;;  %v505_v29 = vsel %vm444_vm0, %v437_v25, 0 }
  0x94   : > { %708 = vmatprep.subr.msk.bf16.mxu1 %vm444_vm0, %v438_v27  ;;  %v401_v30 = vcombine.high %v399_v28, %v399_v28  ;;  %v403_v32 = vpack.c.bf16 %v399_v28, %v399_v28 }
  0x95   : > { %511 = vmatpush1.bf16.msra.mxu1 %v505_v29 }
  0x96   : > { %v404_v33 = vpack.c.bf16 %v401_v30, %v401_v30  ;;  %v446_v34 = vsel %vm444_vm0, %v403_v32, 0 }
  0x98   : > { %705 = vmatprep.subr.msk.bf16.mxu0 %vm444_vm0, %v404_v33  ;;  %709 = vmatmul.mubr.msk.bf16.vlgmr.msra.gmra.mrb[0].mxu1 %vm440_vm1, %v743_v31 }
  0x99   : > { %452 = vmatpush1.bf16.msra.mxu0 %v446_v34 }
  0x9c   : > { %706 = vmatmul.mubr.msk.bf16.vlgmr.msra.gmra.mrb[0].mxu0 %vm440_vm1, %v439_v35 }
 0x16b   : > { %v544_v36 = vpop.f32.mrb[0].mxu1 }
 0x16c   : > { %553 = vst [vmem:[%s367_s10] sm:$0xff] %v544_v36  ;;  %v546_v37 = vpop.f32.mrb[1].mxu1 }
 0x16d   : > { %554 = vst [vmem:[%s367_s10 + $0x8] sm:$0xff] %v546_v37  ;;  %v548_v38 = vpop.f32.mrb[2].mxu1 }
 0x16e   : > { %555 = vst [vmem:[%s367_s10 + $0x10] sm:$0xff] %v548_v38  ;;  %v550_v39 = vpop.f32.mrb[3].mxu1 }
 0x16f   : > { %556 = vst [vmem:[%s367_s10 + $0x18] sm:$0xff] %v550_v39  ;;  %v485_v40 = vpop.f32.mrb[0].mxu0 }
 0x170   : > { %492 = vst [vmem:[%s357_s14] sm:$0xff] %v485_v40  ;;  %v487_v41 = vpop.f32.mrb[1].mxu0 }
 0x171   : > { %493 = vst [vmem:[%s357_s14 + $0x8] sm:$0xff] %v487_v41  ;;  %v489_v42 = vpop.f32.mrb[2].mxu0 }
 0x172   : > { %v490_v43 = vpop.f32.mrb[3].mxu0 }
 0x173 PF: > { %s19_s29 = sadd.s32 1, %s766_s29   ;;  %s883_s27 = smov %s762_s28 }
 0x174   : > { %p16_p5 = scmp.ge.s32.totalorder %s19_s29, 4   ;;  %s884_s28 = smov %s886_s30 }
 0x176   :  { %18 = sbr.rel (!%p16_p5) target bundleno = 2 (0x2), region = 90 }

// kernel: dappm_forward.3
= control target key start
LH: loop header
LB: loop body
LE: loop exit
PB: predicated region body
PF: predicated region fallthrough
CT: control target
= control target key end

     0   :  { %s1952_s13 = smov 0   ;;  %s1954_s14 = smov 0   ;;  %s2200_s0 = inlined_call_operand.vmem [shape: f32[2,4,8,256], index: 0, kind: input, shape index: {}]   ;;  %s2201_s1 = inlined_call_operand.vmem [shape: f32[2,8,256], index: 1, kind: input, shape index: {}]   ;;  %s2202_s2 = inlined_call_operand.vmem [shape: f32[2,16,256], index: 2, kind: input, shape index: {}]   ;;  %s2203_s3 = inlined_call_operand.vmem [shape: f32[9,256], index: 3, kind: input, shape index: {}]   ;;  %s2204_s4 = inlined_call_operand.vmem [shape: f32[4,8,1], index: 4, kind: input, shape index: {}]   ;;  %s2205_s5 = inlined_call_operand.vmem [shape: f32[4,8,1], index: 5, kind: input, shape index: {}]   ;;  %s2206_s6 = inlined_call_operand.vmem [shape: bf16[4,9,8,8], index: 6, kind: input, shape index: {}]   ;;  %s2207_s7 = inlined_call_operand.vmem [shape: f32[5,8,1], index: 7, kind: input, shape index: {}]   ;;  %s2208_s8 = inlined_call_operand.vmem [shape: f32[5,8,1], index: 8, kind: input, shape index: {}]   ;;  %s2209_s9 = inlined_call_operand.vmem [shape: bf16[5,16,8], index: 9, kind: input, shape index: {}]   ;;  %s2210_s10 = inlined_call_operand.vmem [shape: f32[2,16,256], index: 10, kind: output, shape index: {}]  }
   0x1   :  { %2215 = sst [smem:[#allocation8_spill]] %s2200_s0  ;;  %s1956_s15 = smov 0  }
   0x2   :  { %2216 = sst [smem:[#allocation9_spill]] %s2203_s3  ;;  %s1958_s16 = smov 0  }
   0x3   :  { %s1960_s17 = smov 0  }
   0x4 LB: > { %2217 = sst [smem:[#allocation3_spill]] %s1877_s15  ;;  %s29_s18 = sadd.s32 1, %s1877_s15  ;;  %s1885_s17 = sphi %s1960_s17, %s20_s17   ;;  %s1881_s16 = sphi %s1958_s16, %s2228_s16   ;;  %s1877_s15 = sphi %s1956_s15, %s2227_s15   ;;  %s1873_s14 = sphi %s1954_s14, %s2226_s14   ;;  %s1869_s13 = sphi %s1952_s13, %s2225_s13  }
   0x5   : > { %2218 = sst [smem:[#allocation4_spill]] %s1881_s16  ;;  %s32_s19 = sadd.s32 1, %s1881_s16 }
   0x6   : > { %2219 = sst [smem:[#allocation5_spill]] %s1885_s17  ;;  %p30_p0 = scmp.ge.s32.totalorder %s29_s18, 5 }
   0x7   : > { %p1677_p1 = scmp.ge.s32.totalorder %s1885_s17, 1  ;;  %p454_p2 = scmp.lt.s32.totalorder %s1885_s17, 11 }
   0x8   : > { %s2230_s18 = smov (%p30_p0, %s29_s18), 0  ;;  %s2232_s19 = smov (!%p30_p0, %s32_s19), %s1881_s16 }
   0x9   : > { %2220 = sst [smem:[#allocation6_spill]] %s2230_s18  ;;  %p455_p3 = pnand %p1677_p1, %p454_p2 }
   0xa   : > { %p34_p4 = scmp.ge.s32.totalorder %s2232_s19, 2  ;;  %s1678_s20 = sadd.s32 (!%p455_p3), 4294967295, %s1869_s13 }
   0xb   : > { %458 = sbr.rel (%p455_p3) target bundleno = 1155 (0x483), region = 60  ;;  %p547_p5 = scmp.lt.s32.totalorder (!%p455_p3), %s1873_s14, 1 }
   0xc   : > { %s2234_s19 = smov (%p34_p4, %s2232_s19), 0  ;;  %p545_p6 = scmp.gt.s32.totalorder (!%p455_p3), %s1678_s20, 0 }
   0xd   : > { %2221 = sst [smem:[#allocation7_spill]] %s2234_s19  ;;  %p1679_p7 = scmp.lt.s32.totalorder (!%p455_p3), %s1678_s20, 3 }
   0xe   : > { %s2222_s0 = sld [smem:[#allocation8_spill]] (!%p455_p3)  ;;  %p600_p8 = scmp.lt.s32.totalorder (!%p455_p3), %s1869_s13, 4 }
   0xf   : > { %p1718_p9 = scmp.ne.s32.totalorder (!%p455_p3), %s1869_s13, 0 }
  0x12   : > { %s2236_s14 = smov (!%p547_p5, %s1873_s14), 1  ;;  %s2238_s20 = smov (!%p545_p6, %s1678_s20), 0 }
  0x13   : > { %s1685_s21 = sshll.u32 %s2236_s14, 3  ;;  %s1751_s22 = sshll.u32 %s2236_s14, 4  ;;  %v1887_v1 = vmov (!%p1718_p9), 0   ;;  %vm660_vm0 = vcmask (!%p1718_p9), 1043456   ;;  %vm656_vm1 = vcmask (!%p1718_p9), 64512  }
  0x14   : > { %s2240_s20 = smov (!%p1679_p7, %s2238_s20), 3  ;;  %s1988_s25 = scalar_lea.vmem %s2201_s1, %s1751_s22  ;;  %1842 = vset.pattern.permute.xlu0 (!%p1718_p9), %v1887_v1  ;;  %699 = vmatprep.mubr.bf16.mxu0 (!%p1718_p9), %v1887_v1 }
  0x15   : > { %s1752_s26 = sshll.u32 %s2236_s14, 5  ;;  %s1684_s27 = sshll.u32 %s2240_s20, 1  ;;  %v623_v4 = vld [vmem:[%s1988_s25] sm:$0xff] (!%p1718_p9)  ;;  %v624_v5 = vld [vmem:[%s1988_s25 + $0x8] sm:$0xff] (!%p1718_p9) }
  0x16   : > { %s1993_s30 = scalar_lea.vmem %s2202_s2, %s1752_s26  ;;  %s553_s11 = sadd.s32 %s1685_s21, %s1684_s27 }
  0x17   : > { %s1697_s12 = sshll.u32 %s2240_s20, 3  ;;  %s1686_s19 = sshll.u32 %s553_s11, 3  ;;  %v645_v17 = vld [vmem:[%s1993_s30] sm:$0xff] (!%p1718_p9)  ;;  %v646_v18 = vld [vmem:[%s1993_s30 + $0x8] sm:$0xff] (!%p1718_p9)  ;;  %v647_v20 = vld [vmem:[%s1993_s30 + $0x10] sm:$0xff] (!%p1718_p9) }
  0x18   : > { %s1998_s15 = scalar_lea.vmem %s2204_s4, %s1697_s12  ;;  %s2003_s22 = scalar_lea.vmem %s2222_s0, %s1686_s19  ;;  %v648_v23 = vld [vmem:[%s1993_s30 + $0x18] sm:$0xff] (!%p1718_p9) }
  0x19   : > { %s2008_s24 = scalar_lea.vmem %s2205_s5, %s1697_s12  ;;  %s1791_s28 = smul.u32 36, %s2240_s20 }
  0x1a   : > { %s2014_s29 = scalar_lea.vmem %s2210_s10, %s1752_s26  ;;  %622 = sbr.rel (%p1718_p9) target bundleno = 393 (0x189), region = 64 }
  0x1b   : > { %s2019_s11 = scalar_lea.vmem %s2206_s6, %s1791_s28 }
  0x1c   : > { %s601_s3 = scalar_select %p600_p8, %s1869_s13, 4 }
  0x1e   : > { %s1712_s17 = sshll.u32 %s601_s3, 3 }
  0x1f   : > { %s2025_s14 = scalar_lea.vmem %s2207_s7, %s1712_s17  ;;  %s2030_s23 = scalar_lea.vmem %s2208_s8, %s1712_s17 }
  0x20   : > { %s2035_s27 = scalar_lea.vmem %s2209_s9, %s1712_s17  ;;  %v625_v0 = vld [vmem:[%s2025_s14] sm:$0xff] (!%p1718_p9) }
  0x21   : > { %628 = vperm.xlu0 %1842, %v625_v0   ;;  %v633_v2 = vld [vmem:[%s2030_s23] sm:$0xff] }
  0x22   : > { %v1843_v16 = vld [vmem:[%s2035_s27] sm:$0xff]  }
  0x25   : > { %636 = vperm.xlu0 %1842, %v633_v2  }
  0xa0   : > { %v629_v3 = vpop.permute.xlu0 %628 }
  0xa1   : > { %v631_v6 = vmul.f32 %v629_v3, %v623_v4  ;;  %v632_v7 = vmul.f32 %v629_v3, %v624_v5 }
  0xa4   : > { %v637_v8 = vpop.permute.xlu0 %636 }
  0xa5   : > { %v639_v9 = vadd.f32 %v637_v8, %v631_v6  ;;  %v640_v10 = vadd.f32 %v637_v8, %v632_v7 }
  0xa7   : > { %v641_v11 = vmax.f32 %v639_v9, 0.0  ;;  %v642_v12 = vmax.f32 %v640_v10, 0.0 }
  0xa9   : > { %v643_v13 = vpack.c.bf16 %v641_v11, %v641_v11  ;;  %v644_v14 = vpack.c.bf16 %v642_v12, %v642_v12 }
  0xab   : > { %1720 = vmatprep.subr.msk.bf16.mxu0 %vm660_vm0, %v644_v14  ;;  %v662_v15 = vsel %vm660_vm0, %v643_v13, 0 }
  0xac   : > { %668 = vmatpush1.bf16.msra.mxu0 %v662_v15 }
  0xaf   : > { %1721 = vmatmul.mubr.msk.bf16.vlgmr.msra.gmra.mrb[0].mxu0 %vm656_vm1, %v1843_v16 }
 0x182   : > { %v701_v19 = vpop.f32.mrb[0].mxu0 }
 0x183   : > { %v710_v21 = vadd.f32 %v701_v19, %v645_v17  ;;  %v703_v22 = vpop.f32.mrb[1].mxu0 }
 0x184   : > { %v711_v24 = vadd.f32 %v703_v22, %v646_v18  ;;  %v705_v25 = vpop.f32.mrb[2].mxu0 }
 0x185   : > { %714 = vst [vmem:[#allocation2] sm:$0xff] %v710_v21  ;;  %v712_v26 = vadd.f32 %v705_v25, %v647_v20  ;;  %v707_v27 = vpop.f32.mrb[3].mxu0 }
 0x186   : > { %715 = vst [vmem:[#allocation2 + $0x8] sm:$0xff] %v711_v24  ;;  %v713_v28 = vadd.f32 %v707_v27, %v648_v23 }
 0x187   : > { %716 = vst [vmem:[#allocation2 + $0x10] sm:$0xff] %v712_v26 }
 0x188   : > { %717 = vst [vmem:[#allocation2 + $0x18] sm:$0xff] %v713_v28 }
 0x189 PF: > { %p1722_p10 = scmp.le.s32.totalorder %s1869_s13, 0 }
 0x18a   : > { %v728_v29 = vld [vmem:[%s1998_s15] sm:$0xff] (!%p1722_p10)  ;;  %v1888_v30 = vmov (!%p1722_p10), 0   ;;  %v763_v32 = vlaneseq (!%p1722_p10)  ;;  %v723_v34 = vld [vmem:[%s2003_s22 + $0x8] sm:$0xff] (!%p1722_p10)  ;;  %s2223_s30 = sld [smem:[#allocation9_spill]] (!%p1722_p10)  ;;  %vm803_vm2 = vcmask (!%p1722_p10), 1043456   ;;  %s1891_s16 = smov (!%p1722_p10), 17  }
 0x18b   : > { %721 = sbr.rel (%p1722_p10) target bundleno = 1146 (0x47a), region = 68  ;;  %1844 = vset.pattern.permute.xlu0 (!%p1722_p10), %v1888_v30  ;;  %1096 = vmatprep.mubr.bf16.mxu0 (!%p1722_p10), %v1888_v30  ;;  %v736_v31 = vld [vmem:[%s2008_s24] sm:$0xff] (!%p1722_p10)  ;;  %v725_v36 = vld [vmem:[%s1988_s25 + $0x8] sm:$0xff] (!%p1722_p10)  ;;  %v754_v58 = vld [vmem:[%s2019_s11 + $0x10] sm:$0xf] (!%p1722_p10)  ;;  %vm799_vm3 = vcmask (!%p1722_p10), 64512  }
 0x18c   : > { %731 = vperm.xlu0 (!%p1722_p10), %1844, %v728_v29   ;;  %842 = vmatprep.mubr.bf16.mxu1 (!%p1722_p10), %v1888_v30  ;;  %v722_v33 = vld [vmem:[%s2003_s22] sm:$0xff] (!%p1722_p10)  ;;  %v2058_v37 = vshrl.u32 (!%p1722_p10), %v763_v32, 7  ;;  %v727_v39 = vadd.f32 (!%p1722_p10), %v725_v36, %v723_v34  ;;  %s1890_s22 = smov (!%p1722_p10), 16   ;;  %s1892_s18 = smov (!%p1722_p10), 113   ;;  %v2080_v61 = vand.u32 (!%p1722_p10), 127, %v763_v32 }
 0x18d   : > { %1845 = vset.pattern.permute.xlu1 (!%p1722_p10), %v1888_v30  ;;  %v724_v35 = vld [vmem:[%s1988_s25] sm:$0xff] (!%p1722_p10)  ;;  %s1889_s25 = smov (!%p1722_p10), 127   ;;  %s1893_s3 = smov (!%p1722_p10), 15  }
 0x18e   : > { %v726_v38 = vadd.f32 (!%p1722_p10), %v724_v35, %v722_v33  ;;  %v1045_v41 = vsub.s32 (!%p1722_p10), 4, %v2058_v37  ;;  %s1894_s17 = smov (!%p1722_p10), 112   ;;  %s1895_s19 = smov (!%p1722_p10), 1   ;;  %v1391_v59 = vld [vmem:[%s2025_s14] sm:$0xff] (!%p1722_p10)  ;;  %v789_v62 = vsub.s32 (!%p1722_p10), 1, %v2058_v37  ;;  %vm784_vm4 = vcmp.lt.s32.totalorder (!%p1722_p10), %v2080_v61, 16 }
 0x18f   : > { %s1896_s12 = smov (!%p1722_p10), 111   ;;  %v1399_v60 = vld [vmem:[%s2030_s23] sm:$0xff] (!%p1722_p10)  ;;  %v1116_v2 = vsub.s32 (!%p1722_p10), 5, %v2058_v37  ;;  %vm1111_vm5 = vcmp.lt.s32.totalorder (!%p1722_p10), %v2080_v61, 127  ;;  %v770_v8 = vsub.s32 (!%p1722_p10), 0, %v2058_v37  ;;  %vm765_vm6 = vcmp.lt.s32.totalorder (!%p1722_p10), %v2080_v61, 17 }
 0x190   : > { %739 = vperm.xlu0 (!%p1722_p10), %1844, %v736_v31   ;;  %v2064_v42 = vld [vmem:[%s2223_s30 + $0x8] sm:$0xff] (!%p1722_p10)  ;;  %v2069_v43 = vld [vmem:[%s2223_s30] sm:$0xff] (!%p1722_p10)  ;;  %v1187_v20 = vsub.s32 (!%p1722_p10), 6, %v2058_v37  ;;  %vm1182_vm7 = vcmp.lt.s32.totalorder (!%p1722_p10), %v2080_v61, 113  ;;  %v910_v33 = vsub.s32 (!%p1722_p10), 2, %v2058_v37  ;;  %vm905_vm8 = vcmp.lt.s32.totalorder (!%p1722_p10), %v2080_v61, 15 }
 0x191   : > { %v1050_v49 = vrot.slane (!%p1722_p10), %v2064_v42, %v1045_v41  ;;  %v1046_v50 = vrot.slane (!%p1722_p10), %v2069_v43, %v1045_v41  ;;  %v790_v1 = vrot.slane (!%p1722_p10), %v2069_v43, %v789_v62  ;;  %v794_v3 = vrot.slane (!%p1722_p10), %v2064_v42, %v789_v62  ;;  %v751_v25 = vld [vmem:[%s2019_s11 + $0x4] sm:$0xf] (!%p1722_p10) }
 0x192   : > { %v1117_v10 = vrot.slane %v2069_v43, %v1116_v2  ;;  %v1121_v11 = vrot.slane %v2064_v42, %v1116_v2  ;;  %v771_v19 = vrot.slane %v2069_v43, %v770_v8  ;;  %v775_v24 = vrot.slane %v2064_v42, %v770_v8 }
 0x193   : > { %v1188_v32 = vrot.slane %v2069_v43, %v1187_v20  ;;  %vm1253_vm9 = vcmp.lt.s32.totalorder %v2080_v61, 112  ;;  %v981_v62 = vsub.s32 3, %v2058_v37  ;;  %vm976_vm10 = vcmp.lt.s32.totalorder %v2080_v61, 1 }
 0x194   : > { %vm1324_vm11 = vcmp.lt.s32.totalorder %v2080_v61, 111 }
 0x195   : > { %v982_v8 = vrot.slane %v2069_v43, %v981_v62 }
 0x20b   : > { %v732_v40 = vpop.permute.xlu0 %731 }
 0x20c   : > { %v734_v44 = vmul.f32 %v732_v40, %v726_v38  ;;  %v735_v45 = vmul.f32 %v732_v40, %v727_v39  ;;  %v1192_v39 = vrot.slane %v2064_v42, %v1187_v20  ;;  %v755_v40 = vld [vmem:[%s2019_s11 + $0x14] sm:$0xf] }
 0x20f   : > { %v740_v46 = vpop.permute.xlu0 %739 }
 0x210   : > { %v742_v47 = vadd.f32 %v740_v46, %v734_v44  ;;  %v743_v48 = vadd.f32 %v740_v46, %v735_v45 }
 0x212   : > { %v744_v51 = vmax.f32 %v742_v47, 0.0  ;;  %v745_v52 = vmax.f32 %v743_v48, 0.0  ;;  %v911_v48 = vrot.slane %v2069_v43, %v910_v33 }
 0x214   : > { %1107 = vrot.lane.b32.xlu0 %v744_v51, %s1889_s25  ;;  %780 = vrot.lane.b32.xlu1 %v744_v51, %s1890_s22  ;;  %v1052_v53 = vmul.f32 %v1050_v49, %v745_v52  ;;  %v1051_v54 = vmul.f32 %v1046_v50, %v744_v51  ;;  %v1258_v49 = vsub.s32 7, %v2058_v37 }
 0x216   : > { %v1054_v55 = vpack.c.bf16 %v1052_v53, %v1052_v53  ;;  %v1053_v56 = vpack.c.bf16 %v1051_v54, %v1051_v54  ;;  %v915_v53 = vrot.slane %v2064_v42, %v910_v33  ;;  %v1263_v2 = vrot.slane %v2064_v42, %v1258_v49 }
 0x218   : > { %1731 = vmatprep.subr.msk.bf16.mxu0 %vm803_vm2, %v1054_v55  ;;  %759 = vrot.lane.b32.xlu0 %v744_v51, %s1891_s16  ;;  %v1059_v57 = vsel %vm803_vm2, %v1053_v56, 0 }
 0x219   : > { %782 = vrot.lane.b32.xlu1 %v745_v52, %s1890_s22  ;;  %1065 = vmatpush1.bf16.msra.mxu0 %v1059_v57 }
 0x21c   : > { %1178 = vrot.lane.b32.xlu0 %v744_v51, %s1892_s18  ;;  %1732 = vmatmul.mubr.msk.bf16.vlgmr.msra.gmra.mrb[0].mxu0 %vm799_vm3, %v754_v58 }
 0x21d   : > { %1109 = vrot.lane.b32.xlu1 %v745_v52, %s1889_s25  ;;  %1167 = vmatprep.mubr.bf16.mxu0 %v1888_v30 }
 0x220   : > { %901 = vrot.lane.b32.xlu0 %v744_v51, %s1893_s3 }
 0x221   : > { %761 = vrot.lane.b32.xlu1 %v745_v52, %s1891_s16 }
 0x224   : > { %1249 = vrot.lane.b32.xlu0 %v744_v51, %s1894_s17 }
 0x225   : > { %1180 = vrot.lane.b32.xlu1 %v745_v52, %s1892_s18 }
 0x228   : > { %972 = vrot.lane.b32.xlu0 %v744_v51, %s1895_s19 }
 0x229   : > { %903 = vrot.lane.b32.xlu1 %v745_v52, %s1893_s3 }
 0x22c   : > { %1320 = vrot.lane.b32.xlu0 %v744_v51, %s1896_s12 }
 0x22d   : > { %1251 = vrot.lane.b32.xlu1 %v745_v52, %s1894_s17 }
 0x230   : > { %1394 = vperm.xlu0 %1844, %v1391_v59  }
 0x231   : > { %974 = vrot.lane.b32.xlu1 %v745_v52, %s1895_s19 }
 0x235   : > { %1322 = vrot.lane.b32.xlu1 %v745_v52, %s1896_s12 }
 0x239   : > { %1402 = vperm.xlu1 %1845, %v1399_v60   ;;  %v1259_v60 = vrot.slane %v2069_v43, %v1258_v49 }
 0x286   : > { %v1108_v63 = vpop.permute.xlu0 %1107  ;;  %v781_v0 = vpop.permute.xlu1 %780 }
 0x28a   : > { %v760_v4 = vpop.permute.xlu0 %759 }
 0x28b   : > { %v783_v5 = vpop.permute.xlu1 %782 }
 0x28c   : > { %v785_v6 = vsel %vm784_vm4, %v781_v0, %v783_v5  ;;  %v786_v7 = vsel %vm784_vm4, %v783_v5, %v781_v0 }
 0x28d   : > { %v795_v9 = vmul.f32 %v790_v1, %v786_v7  ;;  %v796_v12 = vmul.f32 %v794_v3, %v785_v6  ;;  %v750_v3 = vld [vmem:[%s2019_s11] sm:$0xf] }
 0x28e   : > { %v1179_v13 = vpop.permute.xlu0 %1178 }
 0x28f   : > { %v1110_v14 = vpop.permute.xlu1 %1109  ;;  %v798_v15 = vpack.c.bf16 %v796_v12, %v796_v12  ;;  %v797_v16 = vpack.c.bf16 %v795_v9, %v795_v9 }
 0x290   : > { %v1112_v17 = vsel %vm1111_vm5, %v1108_v63, %v1110_v14  ;;  %v1113_v18 = vsel %vm1111_vm5, %v1110_v14, %v1108_v63  ;;  %v756_v14 = vld [vmem:[%s2019_s11 + $0x18] sm:$0xf] }
 0x291   : > { %v1122_v21 = vmul.f32 %v1117_v10, %v1112_v17  ;;  %v1123_v22 = vmul.f32 %v1121_v11, %v1113_v18  ;;  %1723 = vmatprep.subr.msk.bf16.mxu1 %vm803_vm2, %v798_v15  ;;  %v805_v23 = vsel %vm803_vm2, %v797_v16, 0 }
 0x292   : > { %811 = vmatpush1.bf16.msra.mxu1 %v805_v23  ;;  %v902_v34 = vpop.permute.xlu0 %901 }
 0x293   : > { %v1124_v26 = vpack.c.bf16 %v1122_v21, %v1122_v21  ;;  %v1125_v27 = vpack.c.bf16 %v1123_v22, %v1123_v22  ;;  %v762_v28 = vpop.permute.xlu1 %761  ;;  %v1739_v21 = vld [vmem:[%s2223_s30 + $0x10] ss:$0 sm:$0xff]  ;;  %v1740_v22 = vld [vmem:[%s2223_s30 + $0x18] ss:$0 sm:$0xff] }
 0x294   : > { %v766_v29 = vsel %vm765_vm6, %v760_v4, %v762_v28  ;;  %v767_v31 = vsel %vm765_vm6, %v762_v28, %v760_v4 }
 0x295   : > { %v776_v35 = vmul.f32 %v771_v19, %v767_v31  ;;  %v777_v36 = vmul.f32 %v775_v24, %v766_v29  ;;  %1724 = vmatmul.mubr.msk.bf16.vlgmr.msra.gmra.mrb[0].mxu1 %vm799_vm3, %v751_v25  ;;  %1733 = vmatprep.subr.msk.bf16.mxu0 %vm803_vm2, %v1125_v27  ;;  %v1130_v38 = vsel %vm803_vm2, %v1124_v26, 0  ;;  %v752_v31 = vld [vmem:[%s2019_s11 + $0x8] sm:$0xf] }
 0x296   : > { %1136 = vmatpush1.bf16.msra.mxu0 %v1130_v38  ;;  %892 = vmatprep.mubr.bf16.mxu1 %v1888_v30  ;;  %v1250_v54 = vpop.permute.xlu0 %1249  ;;  %v753_v38 = vld [vmem:[%s2019_s11 + $0xc] sm:$0xf] }
 0x297   : > { %v778_v41 = vpack.c.bf16 %v776_v35, %v776_v35  ;;  %v779_v44 = vpack.c.bf16 %v777_v36, %v777_v36  ;;  %v1181_v45 = vpop.permute.xlu1 %1180  ;;  %v757_v35 = vld [vmem:[%s2019_s11 + $0x1c] sm:$0xf] }
 0x298   : > { %v1183_v46 = vsel %vm1182_vm7, %v1179_v13, %v1181_v45  ;;  %v1184_v47 = vsel %vm1182_vm7, %v1181_v45, %v1179_v13  ;;  %v986_v13 = vrot.slane %v2064_v42, %v981_v62 }
 0x299   : > { %v1193_v50 = vmul.f32 %v1188_v32, %v1183_v46  ;;  %v1194_v51 = vmul.f32 %v1192_v39, %v1184_v47  ;;  %1725 = vmatprep.subr.msk.bf16.mxu1 %vm803_vm2, %v779_v44  ;;  %1734 = vmatmul.mubr.msk.bf16.vlgmr.msra.gmra.mrb[0].mxu0 %vm799_vm3, %v755_v40  ;;  %v855_v52 = vsel %vm803_vm2, %v778_v41, 0  ;;  %v758_v39 = vld [vmem:[%s2019_s11 + $0x20] sm:$0xf] }
 0x29a   : > { %861 = vmatpush1.bf16.msra.mxu1 %v855_v52  ;;  %1238 = vmatprep.mubr.bf16.mxu0 %v1888_v30  ;;  %v973_v9 = vpop.permute.xlu0 %972 }
 0x29b   : > { %v1195_v55 = vpack.c.bf16 %v1193_v50, %v1193_v50  ;;  %v1196_v56 = vpack.c.bf16 %v1194_v51, %v1194_v51  ;;  %v904_v57 = vpop.permute.xlu1 %903 }
 0x29c   : > { %v906_v58 = vsel %vm905_vm8, %v902_v34, %v904_v57  ;;  %v907_v59 = vsel %vm905_vm8, %v904_v57, %v902_v34 }
 0x29d   : > { %v916_v63 = vmul.f32 %v911_v48, %v907_v59  ;;  %v917_v0 = vmul.f32 %v915_v53, %v906_v58  ;;  %1735 = vmatprep.subr.msk.bf16.mxu0 %vm803_vm2, %v1196_v56  ;;  %v1201_v1 = vsel %vm803_vm2, %v1195_v55, 0 }
 0x29e   : > { %1207 = vmatpush1.bf16.msra.mxu0 %v1201_v1  ;;  %v1321_v23 = vpop.permute.xlu0 %1320  ;;  %v1412_v1 = vld [vmem:[#allocation2 + $0x8] sm:$0xff] }
 0x29f   : > { %v918_v4 = vpack.c.bf16 %v916_v63, %v916_v63  ;;  %v919_v5 = vpack.c.bf16 %v917_v0, %v917_v0  ;;  %v1252_v6 = vpop.permute.xlu1 %1251  ;;  %v1846_v63 = vld [vmem:[%s2035_s27] sm:$0xff]  }
 0x2a0   : > { %v1254_v7 = vsel %vm1253_vm9, %v1250_v54, %v1252_v6  ;;  %v1255_v37 = vsel %vm1253_vm9, %v1252_v6, %v1250_v54  ;;  %v1411_v0 = vld [vmem:[#allocation2] sm:$0xff]  ;;  %v1414_v6 = vld [vmem:[#allocation2 + $0x18] sm:$0xff] }
 0x2a1   : > { %v1264_v10 = vmul.f32 %v1259_v60, %v1254_v7  ;;  %v1265_v11 = vmul.f32 %v1263_v2, %v1255_v37  ;;  %1726 = vmatmul.mubr.msk.bf16.vlgmr.msra.gmra.mrb[0].mxu1 %vm799_vm3, %v750_v3  ;;  %1727 = vmatprep.subr.msk.bf16.mxu1 %vm803_vm2, %v919_v5  ;;  %v924_v12 = vsel %vm803_vm2, %v918_v4, 0  ;;  %v1413_v3 = vld [vmem:[#allocation2 + $0x10] sm:$0xff] }
 0x2a2   : > { %930 = vmatpush1.bf16.msra.mxu1 %v924_v12  ;;  %961 = vmatprep.mubr.bf16.mxu1 %v1888_v30 }
 0x2a3   : > { %v1266_v15 = vpack.c.bf16 %v1264_v10, %v1264_v10  ;;  %v1267_v16 = vpack.c.bf16 %v1265_v11, %v1265_v11  ;;  %v975_v17 = vpop.permute.xlu1 %974 }
 0x2a4   : > { %v977_v43 = vsel %vm976_vm10, %v973_v9, %v975_v17  ;;  %v978_v18 = vsel %vm976_vm10, %v975_v17, %v973_v9 }
 0x2a5   : > { %v987_v19 = vmul.f32 %v982_v8, %v978_v18  ;;  %v988_v20 = vmul.f32 %v986_v13, %v977_v43  ;;  %1736 = vmatmul.mubr.msk.bf16.vlgmr.msra.gmra.mrb[0].mxu0 %vm799_vm3, %v756_v14  ;;  %1737 = vmatprep.subr.msk.bf16.mxu0 %vm803_vm2, %v1267_v16  ;;  %v1272_v42 = vsel %vm803_vm2, %v1266_v15, 0 }
 0x2a6   : > { %1278 = vmatpush1.bf16.msra.mxu0 %v1272_v42  ;;  %1309 = vmatprep.mubr.bf16.mxu0 %v1888_v30 }
 0x2a7   : > { %v990_v24 = vpack.c.bf16 %v988_v20, %v988_v20  ;;  %v1323_v25 = vpop.permute.xlu1 %1322  ;;  %v989_v28 = vpack.c.bf16 %v987_v19, %v987_v19 }
 0x2a8   : > { %v1325_v26 = vsel %vm1324_vm11, %v1321_v23, %v1323_v25  ;;  %v1326_v27 = vsel %vm1324_vm11, %v1323_v25, %v1321_v23 }
 0x2a9   : > { %v1335_v29 = vmul.f32 %v1739_v21, %v1325_v26  ;;  %v1336_v61 = vmul.f32 %v1740_v22, %v1326_v27  ;;  %1729 = vmatprep.subr.msk.bf16.mxu1 %vm803_vm2, %v990_v24  ;;  %v995_v34 = vsel %vm803_vm2, %v989_v28, 0 }
 0x2ab   : > { %v1338_v32 = vpack.c.bf16 %v1336_v61, %v1336_v61  ;;  %v1337_v33 = vpack.c.bf16 %v1335_v29, %v1335_v29 }
 0x2ad   : > { %1728 = vmatmul.mubr.msk.bf16.vlgmr.msra.gmra.mrb[0].mxu1 %vm799_vm3, %v752_v31  ;;  %1741 = vmatprep.subr.msk.bf16.mxu0 %vm803_vm2, %v1338_v32  ;;  %v1343_v36 = vsel %vm803_vm2, %v1337_v33, 0 }
 0x2ae   : > { %1001 = vmatpush1.bf16.msra.mxu1 %v995_v34  ;;  %1032 = vmatprep.mubr.bf16.mxu1 %v1888_v30 }
 0x2af   : > { %v1395_v47 = vpop.permute.xlu0 %1394 }
 0x2b1   : > { %1738 = vmatmul.mubr.msk.bf16.vlgmr.msra.gmra.mrb[0].mxu0 %vm799_vm3, %v757_v35 }
 0x2b2   : > { %1349 = vmatpush1.bf16.msra.mxu0 %v1343_v36  ;;  %1380 = vmatprep.mubr.bf16.mxu0 %v1888_v30 }
 0x2b8   : > { %v1403_v52 = vpop.permute.xlu1 %1402 }
 0x2b9   : > { %1730 = vmatmul.mubr.msk.bf16.vlgmr.msra.gmra.mrb[0].mxu1 %vm799_vm3, %v753_v38 }
 0x2ba   : > { %1463 = vmatprep.mubr.bf16.mxu1 %v1888_v30 }
 0x2bd   : > { %1742 = vmatmul.mubr.msk.bf16.vlgmr.msra.gmra.mrb[0].mxu0 %vm799_vm3, %v758_v39 }
 0x38c   : > { %v1034_v40 = vpop.f32.mrb[0].mxu1 }
 0x38d   : > { %v1036_v41 = vpop.f32.mrb[1].mxu1 }
 0x38e   : > { %v1038_v44 = vpop.f32.mrb[2].mxu1 }
 0x38f   : > { %v1039_v45 = vpop.f32.mrb[3].mxu1 }
 0x390   : > { %v1382_v46 = vpop.f32.mrb[0].mxu0 }
 0x391   : > { %v1761_v48 = vadd.f32 %v1382_v46, %v1034_v40  ;;  %v1384_v49 = vpop.f32.mrb[1].mxu0 }
 0x392   : > { %v1762_v50 = vadd.f32 %v1384_v49, %v1036_v41  ;;  %v1386_v51 = vpop.f32.mrb[2].mxu0 }
 0x393   : > { %v1387_v53 = vpop.f32.mrb[3].mxu0  ;;  %v1397_v54 = vmul.f32 %v1761_v48, %v1395_v47 }
 0x394   : > { %v1398_v55 = vmul.f32 %v1762_v50, %v1395_v47 }
 0x395   : > { %v1405_v56 = vadd.f32 %v1403_v52, %v1397_v54 }
 0x396   : > { %v1406_v57 = vadd.f32 %v1403_v52, %v1398_v55 }
 0x397   : > { %v1407_v30 = vmax.f32 %v1405_v56, 0.0 }
 0x398   : > { %v1408_v58 = vmax.f32 %v1406_v57, 0.0 }
 0x399   : > { %v1409_v59 = vpack.c.bf16 %v1407_v30, %v1407_v30 }
 0x39a   : > { %v1410_v60 = vpack.c.bf16 %v1408_v58, %v1408_v58 }
 0x39b   : > { %v1426_v62 = vsel %vm803_vm2, %v1409_v59, 0 }
 0x39c   : > { %1744 = vmatprep.subr.msk.bf16.mxu1 %vm803_vm2, %v1410_v60 }
 0x39d   : > { %1432 = vmatpush1.bf16.msra.mxu1 %v1426_v62 }
 0x3a0   : > { %1745 = vmatmul.mubr.msk.bf16.vlgmr.msra.gmra.mrb[4].mxu1 %vm799_vm3, %v1846_v63 }
 0x473   : > { %v1465_v2 = vpop.f32.mrb[4].mxu1 }
 0x474   : > { %v1474_v4 = vadd.f32 %v1465_v2, %v1411_v0  ;;  %v1467_v5 = vpop.f32.mrb[5].mxu1 }
 0x475   : > { %v1475_v7 = vadd.f32 %v1467_v5, %v1412_v1  ;;  %v1469_v37 = vpop.f32.mrb[6].mxu1 }
 0x476   : > { %1478 = vst [vmem:[#allocation2] sm:$0xff] %v1474_v4  ;;  %v1476_v8 = vadd.f32 %v1469_v37, %v1413_v3  ;;  %v1471_v9 = vpop.f32.mrb[7].mxu1 }
 0x477   : > { %1479 = vst [vmem:[#allocation2 + $0x8] sm:$0xff] %v1475_v7  ;;  %v1477_v10 = vadd.f32 %v1471_v9, %v1414_v6 }
 0x478   : > { %1480 = vst [vmem:[#allocation2 + $0x10] sm:$0xff] %v1476_v8 }
 0x479   : > { %1481 = vst [vmem:[#allocation2 + $0x18] sm:$0xff] %v1477_v10 }
 0x47a PF: > { %p1746_p11 = scmp.ne.s32.totalorder %s1869_s13, 4 }
 0x47c   : > { %1485 = sbr.rel (%p1746_p11) target bundleno = 1155 (0x483), region = 72 }
 0x47d   : > { %v1486_v11 = vld [vmem:[#allocation2] sm:$0xff] (!%p1746_p11) }
 0x47e   : > { %v1487_v12 = vld [vmem:[#allocation2 + $0x8] sm:$0xff] (!%p1746_p11)  ;;  %1490 = vst [vmem:[%s2014_s29] sm:$0xff] (!%p1746_p11), %v1486_v11 }
 0x47f   : > { %v1488_v13 = vld [vmem:[#allocation2 + $0x10] sm:$0xff] (!%p1746_p11)  ;;  %1491 = vst [vmem:[%s2014_s29 + $0x8] sm:$0xff] (!%p1746_p11), %v1487_v12 }
 0x480   : > { %1492 = vst [vmem:[%s2014_s29 + $0x10] sm:$0xff] (!%p1746_p11), %v1488_v13  ;;  %v1489_v14 = vld [vmem:[#allocation2 + $0x18] sm:$0xff] (!%p1746_p11) }
 0x481   : > { %1493 = vst [vmem:[%s2014_s29 + $0x18] sm:$0xff] (!%p1746_p11), %v1489_v14 }
 0x483 PF: > { %s2224_s11 = sld [smem:[#allocation5_spill]]  ;;  %s2225_s13 = sld [smem:[#allocation3_spill]] }
 0x484   : > { %s2226_s14 = sld [smem:[#allocation4_spill]]  ;;  %s2227_s15 = sld [smem:[#allocation6_spill]] }
 0x485   : > { %s2228_s16 = sld [smem:[#allocation7_spill]] }
 0x489   : > { %s20_s17 = sadd.s32 1, %s2224_s11  }
 0x48a   : > { %p17_p12 = scmp.ge.s32.totalorder %s20_s17, 12  }
 0x48c   :  { %19 = sbr.rel (!%p17_p12) target bundleno = 4 (0x4), region = 126 }

</bundles_post_ra>
